<compile_context>
chip_gen: v7x
topology: tpu7x:2x2x1
jax: 0.10.0
libtpu: 0.0.40
codegen_flags: <defaults>
</compile_context>

<pallas_src>
import functools

import jax
import jax.numpy as jnp
import numpy as np
from jax.experimental import pallas as pl
from jax.experimental.pallas import tpu as pltpu

EPS = 1e-5     # nn.BatchNorm2d default eps
LANE = 128     # TPU lane width


# ------------------------------ Pallas kernel ------------------------------ #

def _encoder_kernel(x_ref, g_ref, w_ref, b_ref, h1_ref, h2_ref, h4_ref,
                    *, tap_offsets, tap_counts):
    """Whole encoder in one kernel.

    x_ref : [M, L]    bf16  input image rows      (M = padded N*H, L = 128)
    g_ref : [T, M, M] bf16  per-tap 0/1 row-gather matrices (stride + H pad)
    w_ref : [T, L, L] bf16  per-tap unrolled conv weights (BN scale folded in)
    b_ref : [7, 1, L] f32   per-layer folded BN bias (tiled over W positions)
    h*_ref: [rows, L] f32   outputs of DownConv1, DownConv2, ResBlock2
    """

    def conv_layer(h, layer, residual=None):
        hb = h.astype(jnp.bfloat16)                       # MXU operand dtype
        off = tap_offsets[layer]
        acc = None
        for t in range(tap_counts[layer]):                # 3 or 4 taps, unrolled
            rows = jnp.dot(g_ref[off + t], hb,            # exact 0/1 row gather
                           preferred_element_type=jnp.float32)
            y = jnp.dot(rows.astype(jnp.bfloat16), w_ref[off + t],
                        preferred_element_type=jnp.float32)
            acc = y if acc is None else acc + y
        acc = acc + b_ref[layer]                          # folded BN bias (f32)
        if residual is not None:
            acc = acc + residual                          # ResBlock skip (f32)
        return jnp.maximum(acc, 0.0)                      # ReLU

    h1 = conv_layer(x_ref[...], 0)                        # DownConv1
    h2 = conv_layer(h1, 1)                                # DownConv2
    h3 = conv_layer(h2, 2)                                # DownConv3
    r1 = conv_layer(h3, 3)                                # ResBlock1.conv1
    r1 = conv_layer(r1, 4, residual=h3)                   # ResBlock1.conv2+skip
    r2 = conv_layer(r1, 5)                                # ResBlock2.conv1
    h4 = conv_layer(r2, 6, residual=r1)                   # ResBlock2.conv2+skip

    h1_ref[...] = h1[:h1_ref.shape[0]]
    h2_ref[...] = h2[:h2_ref.shape[0]]
    h4_ref[...] = h4[:h4_ref.shape[0]]


# ------------------- host-side parameter folding (one-off) ----------------- #

_LAYER_SPECS = (("dc1", "w", "bn", 2, 1), ("dc2", "w", "bn", 2, 1),
                ("dc3", "w", "bn", 2, 1),
                ("rb1", "w1", "bn1", 1, 1), ("rb1", "w2", "bn2", 1, 1),
                ("rb2", "w1", "bn1", 1, 1), ("rb2", "w2", "bn2", 1, 1))

_OUTPUT_LAYERS = (0, 1, 6)   # DownConv1, DownConv2, ResBlock2 outputs


def fold_encoder_params(params, batch, in_hw=16, in_channels=3):
    """Fold PyTorch-layout conv weights + BN running stats (inference mode)
    into the matmul operands consumed by the fused kernel.  Pure numpy,
    executed once outside jit."""
    H = W = in_hw
    C = in_channels
    geoms, raw = [], []
    for blk, wk, bnk, s, p in _LAYER_SPECS:
        w = np.asarray(params[blk][wk], np.float32)
        bn = {k: np.asarray(v, np.float32) for k, v in params[blk][bnk].items()}
        co, ci, kh, kw = w.shape
        assert ci == C, (ci, C)
        Ho = (H + 2 * p - kh) // s + 1
        Wo = (W + 2 * p - kw) // s + 1
        geoms.append(dict(Hi=H, Wi=W, Ci=C, Ho=Ho, Wo=Wo, Co=co,
                          kh=kh, kw=kw, s=s, p=p))
        raw.append((w, bn))
        H, W, C = Ho, Wo, co

    lane = max(max(g["Wi"] * g["Ci"], g["Wo"] * g["Co"]) for g in geoms)
    lane = ((lane + LANE - 1) // LANE) * LANE                 # pad K to 128
    m_pad = max(max(batch * g["Hi"], batch * g["Ho"]) for g in geoms)
    m_pad = ((m_pad + 7) // 8) * 8                            # sublane align

    g_taps, w_taps, biases = [], [], []
    tap_offsets, tap_counts = [], []
    for (w, bn), g in zip(raw, geoms):
        scale = bn["gamma"] / np.sqrt(bn["var"] + EPS)
        bias = bn["beta"] - bn["mean"] * scale
        ws = w * scale[:, None, None, None]                   # BN scale -> W
        Hi, Wi, Ci = g["Hi"], g["Wi"], g["Ci"]
        Ho, Wo, Co = g["Ho"], g["Wo"], g["Co"]
        s, p, kh, kw = g["s"], g["p"], g["kh"], g["kw"]
        tap_offsets.append(len(w_taps))
        tap_counts.append(kh)
        for i in range(kh):
            # Conv unrolled along W + channels: handles W-padding via zeros.
            wrow = np.zeros((lane, lane), np.float32)
            for c in range(Wo):
                for j in range(kw):
                    q = s * c - p + j                          # input column
                    if 0 <= q < Wi:
                        wrow[q * Ci:(q + 1) * Ci, c * Co:(c + 1) * Co] = \
                            ws[:, :, i, j].T
            w_taps.append(wrow)
            # 0/1 row gather: handles H stride + H-padding (zero rows).
            gm = np.zeros((m_pad, m_pad), np.float32)
            for n in range(batch):
                for r in range(Ho):
                    q = s * r - p + i                          # input row
                    if 0 <= q < Hi:
                        gm[n * Ho + r, n * Hi + q] = 1.0
            g_taps.append(gm)
        bvec = np.zeros((lane,), np.float32)
        bvec[:Wo * Co] = np.tile(bias, Wo)
        biases.append(bvec)

    return dict(
        g=jnp.asarray(np.stack(g_taps), jnp.bfloat16),
        w=jnp.asarray(np.stack(w_taps), jnp.bfloat16),
        b=jnp.asarray(np.stack(biases)[:, None, :], jnp.float32),
        tap_offsets=tuple(tap_offsets), tap_counts=tuple(tap_counts),
        geoms=tuple(geoms), lane=lane, m_pad=m_pad, batch=batch)


# ------------------------------- forward pass ------------------------------ #

def encoder_forward(x_nchw, folded):
    """Pallas implementation of Encoder.forward.  Returns [xs0, xs1, xs2] (NCHW)."""
    n, c, h, w = x_nchw.shape
    lane, m_pad = folded["lane"], folded["m_pad"]
    geoms = folded["geoms"]
    assert (n, c, h, w) == (folded["batch"], geoms[0]["Ci"],
                            geoms[0]["Hi"], geoms[0]["Wi"])

    # NCHW -> NHWC -> [N*H, W*C] row layout, zero-padded to [m_pad, lane].
    x_rows = jnp.transpose(x_nchw, (0, 2, 3, 1)).reshape(n * h, w * c)
    x_rows = jnp.pad(x_rows, ((0, m_pad - n * h), (0, lane - w * c)))
    x_rows = x_rows.astype(jnp.bfloat16)

    out_rows = tuple(((n * geoms[l]["Ho"] + 7) // 8) * 8 for l in _OUTPUT_LAYERS)
    out_shape = tuple(jax.ShapeDtypeStruct((r, lane), jnp.float32)
                      for r in out_rows)

    vmem = pl.BlockSpec(memory_space=pltpu.MemorySpace.VMEM)
    kernel = functools.partial(_encoder_kernel,
                               tap_offsets=folded["tap_offsets"],
                               tap_counts=folded["tap_counts"])
    raw = pl.pallas_call(
        kernel,
        out_shape=out_shape,
        in_specs=[vmem, vmem, vmem, vmem],
        out_specs=(vmem, vmem, vmem),
    )(x_rows, folded["g"], folded["w"], folded["b"])

    outs = []
    for r, l in zip(raw, _OUTPUT_LAYERS):
        g = geoms[l]
        t = r[:n * g["Ho"], :g["Wo"] * g["Co"]].reshape(n, g["Ho"], g["Wo"], g["Co"])
        outs.append(jnp.transpose(t, (0, 3, 1, 2)))    # NHWC -> NCHW
    return outs


# ------------------------------ parameter init ----------------------------- #

def init_params(key, in_channels=3, hidden_channels=16):
    def conv_w(k, cout, cin, ksz):
        fan_in = cin * ksz * ksz
        return (jax.random.normal(k, (cout, cin, ksz, ksz), jnp.float32)
                / jnp.sqrt(fan_in))

    def bn_p(k, c):
        k1, k2, k3, k4 = jax.random.split(k, 4)
        return dict(
            gamma=1.0 + 0.1 * jax.random.normal(k1, (c,), jnp.float32),
            beta=0.1 * jax.random.normal(k2, (c,), jnp.float32),
            mean=0.1 * jax.random.normal(k3, (c,), jnp.float32),
            var=1.0 + 0.1 * jnp.abs(jax.random.normal(k4, (c,), jnp.float32)),
        )

    h = hidden_channels
    keys = jax.random.split(key, 14)
    return {
        "dc1": dict(w=conv_w(keys[0], h, in_channels, 4), bn=bn_p(keys[1], h)),
        "dc2": dict(w=conv_w(keys[2], 2 * h, h, 4), bn=bn_p(keys[3], 2 * h)),
        "dc3": dict(w=conv_w(keys[4], 4 * h, 2 * h, 4), bn=bn_p(keys[5], 4 * h)),
        "rb1": dict(w1=conv_w(keys[6], 4 * h, 4 * h, 3), bn1=bn_p(keys[7], 4 * h),
                    w2=conv_w(keys[8], 4 * h, 4 * h, 3), bn2=bn_p(keys[9], 4 * h)),
        "rb2": dict(w1=conv_w(keys[10], 4 * h, 4 * h, 3), bn1=bn_p(keys[11], 4 * h),
                    w2=conv_w(keys[12], 4 * h, 4 * h, 3), bn2=bn_p(keys[13], 4 * h)),
    }


# ------------------------- pure-JAX reference check ------------------------ #

def _bn_fold(bn):
    scale = bn["gamma"] / jnp.sqrt(bn["var"] + EPS)
    return scale, bn["beta"] - bn["mean"] * scale


def _ref_conv_bn_relu(x, w, bn, stride, pad, residual=None):
    y = jax.lax.conv_general_dilated(
        x, jnp.transpose(w, (2, 3, 1, 0)),
        window_strides=(stride, stride),
        padding=[(pad, pad), (pad, pad)],
        dimension_numbers=("NHWC", "HWIO", "NHWC"),
        precision=jax.lax.Precision.HIGHEST)
    scale, bias = _bn_fold(bn)
    y = y * scale + bias
    if residual is not None:
        y = y + residual
    return jnp.maximum(y, 0.0)


def _ref_encoder(x_nchw, params):
    x = jnp.transpose(x_nchw, (0, 2, 3, 1))
    h1 = _ref_conv_bn_relu(x, params["dc1"]["w"], params["dc1"]["bn"], 2, 1)
    h2 = _ref_conv_bn_relu(h1, params["dc2"]["w"], params["dc2"]["bn"], 2, 1)
    h3 = _ref_conv_bn_relu(h2, params["dc3"]["w"], params["dc3"]["bn"], 2, 1)

    def rb(h, p):
        t = _ref_conv_bn_relu(h, p["w1"], p["bn1"], 1, 1)
        return _ref_conv_bn_relu(t, p["w2"], p["bn2"], 1, 1, residual=h)

    h4 = rb(rb(h3, params["rb1"]), params["rb2"])
    return [jnp.transpose(t, (0, 3, 1, 2)) for t in (h1, h2, h4)]


# ----------------------------------- main ----------------------------------- #

if __name__ == "__main__":
    # TODO(synk): nn.BatchNorm2d training-mode (batch-statistics) normalization
    # is not reproduced; inference-mode running-stat folding is used instead.
    key = jax.random.PRNGKey(0)
    k_param, k_x = jax.random.split(key)

    params = init_params(k_param, in_channels=3, hidden_channels=16)
    x = jax.random.normal(k_x, (2, 3, 16, 16), jnp.float32)   # NCHW like PyTorch

    folded = fold_encoder_params(params, batch=x.shape[0],
                                 in_hw=x.shape[2], in_channels=x.shape[1])
    fwd = jax.jit(lambda inp: encoder_forward(inp, folded))

    outs = jax.block_until_ready(fwd(x))
    refs = jax.block_until_ready(_ref_encoder(x, params))

    expected_shapes = [(2, 16, 8, 8), (2, 32, 4, 4), (2, 64, 2, 2)]
    # The kernel feeds the MXU bf16 operands (per perf feedback) while the
    # reference runs in full f32, so the tolerance accounts for ~7 chained
    # convolutions of bf16-rounded operands (f32 accumulation/epilogue).
    for o, r, s in zip(outs, refs, expected_shapes):
        assert o.shape == s, (o.shape, s)
        np.testing.assert_allclose(np.asarray(o), np.asarray(r),
                                   atol=5e-2, rtol=5e-2)

    print("KERNEL_OK")
</pallas_src>

<mosaic_0001>
module attributes {stable_mosaic.version = 11 : i64} {
  func.func @_encoder_kernel(%arg0: memref<32x128xbf16, #tpu.memory_space<vmem>>, %arg1: memref<24x32x32xbf16, #tpu.memory_space<vmem>>, %arg2: memref<24x128x128xbf16, #tpu.memory_space<vmem>>, %arg3: memref<7x1x128xf32, #tpu.memory_space<vmem>>, %arg4: memref<16x128xf32, #tpu.memory_space<vmem>>, %arg5: memref<8x128xf32, #tpu.memory_space<vmem>>, %arg6: memref<8x128xf32, #tpu.memory_space<vmem>>) attributes {dimension_semantics = [], scalar_prefetch = 0 : i64, scratch_operands = 0 : i64, tpu.core_type = #tpu.core_type<tc>} {
    %c0 = arith.constant 0 : index
    %c0_0 = arith.constant 0 : index
    %0 = vector.load %arg0[%c0, %c0_0] : memref<32x128xbf16, #tpu.memory_space<vmem>>, vector<32x128xbf16>
    %c0_1 = arith.constant 0 : index
    %c0_2 = arith.constant 0 : index
    %c0_3 = arith.constant 0 : index
    %1 = vector.load %arg1[%c0_1, %c0_2, %c0_3] : memref<24x32x32xbf16, #tpu.memory_space<vmem>>, vector<1x32x32xbf16>
    %2 = vector.shape_cast %1 : vector<1x32x32xbf16> to vector<32x32xbf16>
    %cst = arith.constant dense<0.000000e+00> : vector<32x128xf32>
    %3 = tpu.matmul %2, %0, %cst {dimension_numbers = #tpu.dot_dimension_numbers<[1], [0], [0], [1], [0, 0, 1, 1], [], []>} : vector<32x32xbf16>, vector<32x128xbf16>, vector<32x128xf32> -> vector<32x128xf32>
    %4 = arith.truncf %3 : vector<32x128xf32> to vector<32x128xbf16>
    %c0_4 = arith.constant 0 : index
    %c0_5 = arith.constant 0 : index
    %c0_6 = arith.constant 0 : index
    %5 = vector.load %arg2[%c0_4, %c0_5, %c0_6] : memref<24x128x128xbf16, #tpu.memory_space<vmem>>, vector<1x128x128xbf16>
    %6 = vector.shape_cast %5 : vector<1x128x128xbf16> to vector<128x128xbf16>
    %cst_7 = arith.constant dense<0.000000e+00> : vector<32x128xf32>
    %7 = tpu.matmul %4, %6, %cst_7 {dimension_numbers = #tpu.dot_dimension_numbers<[1], [0], [0], [1], [0, 0, 1, 1], [], []>} : vector<32x128xbf16>, vector<128x128xbf16>, vector<32x128xf32> -> vector<32x128xf32>
    %c1 = arith.constant 1 : index
    %c0_8 = arith.constant 0 : index
    %c0_9 = arith.constant 0 : index
    %8 = vector.load %arg1[%c1, %c0_8, %c0_9] : memref<24x32x32xbf16, #tpu.memory_space<vmem>>, vector<1x32x32xbf16>
    %9 = vector.shape_cast %8 : vector<1x32x32xbf16> to vector<32x32xbf16>
    %cst_10 = arith.constant dense<0.000000e+00> : vector<32x128xf32>
    %10 = tpu.matmul %9, %0, %cst_10 {dimension_numbers = #tpu.dot_dimension_numbers<[1], [0], [0], [1], [0, 0, 1, 1], [], []>} : vector<32x32xbf16>, vector<32x128xbf16>, vector<32x128xf32> -> vector<32x128xf32>
    %11 = arith.truncf %10 : vector<32x128xf32> to vector<32x128xbf16>
    %c1_11 = arith.constant 1 : index
    %c0_12 = arith.constant 0 : index
    %c0_13 = arith.constant 0 : index
    %12 = vector.load %arg2[%c1_11, %c0_12, %c0_13] : memref<24x128x128xbf16, #tpu.memory_space<vmem>>, vector<1x128x128xbf16>
    %13 = vector.shape_cast %12 : vector<1x128x128xbf16> to vector<128x128xbf16>
    %cst_14 = arith.constant dense<0.000000e+00> : vector<32x128xf32>
    %14 = tpu.matmul %11, %13, %cst_14 {dimension_numbers = #tpu.dot_dimension_numbers<[1], [0], [0], [1], [0, 0, 1, 1], [], []>} : vector<32x128xbf16>, vector<128x128xbf16>, vector<32x128xf32> -> vector<32x128xf32>
    %15 = arith.addf %7, %14 : vector<32x128xf32>
    %c2 = arith.constant 2 : index
    %c0_15 = arith.constant 0 : index
    %c0_16 = arith.constant 0 : index
    %16 = vector.load %arg1[%c2, %c0_15, %c0_16] : memref<24x32x32xbf16, #tpu.memory_space<vmem>>, vector<1x32x32xbf16>
    %17 = vector.shape_cast %16 : vector<1x32x32xbf16> to vector<32x32xbf16>
    %cst_17 = arith.constant dense<0.000000e+00> : vector<32x128xf32>
    %18 = tpu.matmul %17, %0, %cst_17 {dimension_numbers = #tpu.dot_dimension_numbers<[1], [0], [0], [1], [0, 0, 1, 1], [], []>} : vector<32x32xbf16>, vector<32x128xbf16>, vector<32x128xf32> -> vector<32x128xf32>
    %19 = arith.truncf %18 : vector<32x128xf32> to vector<32x128xbf16>
    %c2_18 = arith.constant 2 : index
    %c0_19 = arith.constant 0 : index
    %c0_20 = arith.constant 0 : index
    %20 = vector.load %arg2[%c2_18, %c0_19, %c0_20] : memref<24x128x128xbf16, #tpu.memory_space<vmem>>, vector<1x128x128xbf16>
    %21 = vector.shape_cast %20 : vector<1x128x128xbf16> to vector<128x128xbf16>
    %cst_21 = arith.constant dense<0.000000e+00> : vector<32x128xf32>
    %22 = tpu.matmul %19, %21, %cst_21 {dimension_numbers = #tpu.dot_dimension_numbers<[1], [0], [0], [1], [0, 0, 1, 1], [], []>} : vector<32x128xbf16>, vector<128x128xbf16>, vector<32x128xf32> -> vector<32x128xf32>
    %23 = arith.addf %15, %22 : vector<32x128xf32>
    %c3 = arith.constant 3 : index
    %c0_22 = arith.constant 0 : index
    %c0_23 = arith.constant 0 : index
    %24 = vector.load %arg1[%c3, %c0_22, %c0_23] : memref<24x32x32xbf16, #tpu.memory_space<vmem>>, vector<1x32x32xbf16>
    %25 = vector.shape_cast %24 : vector<1x32x32xbf16> to vector<32x32xbf16>
    %cst_24 = arith.constant dense<0.000000e+00> : vector<32x128xf32>
    %26 = tpu.matmul %25, %0, %cst_24 {dimension_numbers = #tpu.dot_dimension_numbers<[1], [0], [0], [1], [0, 0, 1, 1], [], []>} : vector<32x32xbf16>, vector<32x128xbf16>, vector<32x128xf32> -> vector<32x128xf32>
    %27 = arith.truncf %26 : vector<32x128xf32> to vector<32x128xbf16>
    %c3_25 = arith.constant 3 : index
    %c0_26 = arith.constant 0 : index
    %c0_27 = arith.constant 0 : index
    %28 = vector.load %arg2[%c3_25, %c0_26, %c0_27] : memref<24x128x128xbf16, #tpu.memory_space<vmem>>, vector<1x128x128xbf16>
    %29 = vector.shape_cast %28 : vector<1x128x128xbf16> to vector<128x128xbf16>
    %cst_28 = arith.constant dense<0.000000e+00> : vector<32x128xf32>
    %30 = tpu.matmul %27, %29, %cst_28 {dimension_numbers = #tpu.dot_dimension_numbers<[1], [0], [0], [1], [0, 0, 1, 1], [], []>} : vector<32x128xbf16>, vector<128x128xbf16>, vector<32x128xf32> -> vector<32x128xf32>
    %31 = arith.addf %23, %30 : vector<32x128xf32>
    %c0_29 = arith.constant 0 : index
    %c0_30 = arith.constant 0 : index
    %c0_31 = arith.constant 0 : index
    %32 = vector.load %arg3[%c0_29, %c0_30, %c0_31] : memref<7x1x128xf32, #tpu.memory_space<vmem>>, vector<1x1x128xf32>
    %33 = vector.shape_cast %32 : vector<1x1x128xf32> to vector<1x128xf32>
    %34 = vector.broadcast %33 : vector<1x128xf32> to vector<32x128xf32>
    %35 = arith.addf %31, %34 : vector<32x128xf32>
    %cst_32 = arith.constant 0.000000e+00 : f32
    %36 = vector.broadcast %cst_32 : f32 to vector<32x128xf32>
    %37 = arith.maximumf %35, %36 : vector<32x128xf32>
    %38 = arith.truncf %37 : vector<32x128xf32> to vector<32x128xbf16>
    %c4 = arith.constant 4 : index
    %c0_33 = arith.constant 0 : index
    %c0_34 = arith.constant 0 : index
    %39 = vector.load %arg1[%c4, %c0_33, %c0_34] : memref<24x32x32xbf16, #tpu.memory_space<vmem>>, vector<1x32x32xbf16>
    %40 = vector.shape_cast %39 : vector<1x32x32xbf16> to vector<32x32xbf16>
    %cst_35 = arith.constant dense<0.000000e+00> : vector<32x128xf32>
    %41 = tpu.matmul %40, %38, %cst_35 {dimension_numbers = #tpu.dot_dimension_numbers<[1], [0], [0], [1], [0, 0, 1, 1], [], []>} : vector<32x32xbf16>, vector<32x128xbf16>, vector<32x128xf32> -> vector<32x128xf32>
    %42 = arith.truncf %41 : vector<32x128xf32> to vector<32x128xbf16>
    %c4_36 = arith.constant 4 : index
    %c0_37 = arith.constant 0 : index
    %c0_38 = arith.constant 0 : index
    %43 = vector.load %arg2[%c4_36, %c0_37, %c0_38] : memref<24x128x128xbf16, #tpu.memory_space<vmem>>, vector<1x128x128xbf16>
    %44 = vector.shape_cast %43 : vector<1x128x128xbf16> to vector<128x128xbf16>
    %cst_39 = arith.constant dense<0.000000e+00> : vector<32x128xf32>
    %45 = tpu.matmul %42, %44, %cst_39 {dimension_numbers = #tpu.dot_dimension_numbers<[1], [0], [0], [1], [0, 0, 1, 1], [], []>} : vector<32x128xbf16>, vector<128x128xbf16>, vector<32x128xf32> -> vector<32x128xf32>
    %c5 = arith.constant 5 : index
    %c0_40 = arith.constant 0 : index
    %c0_41 = arith.constant 0 : index
    %46 = vector.load %arg1[%c5, %c0_40, %c0_41] : memref<24x32x32xbf16, #tpu.memory_space<vmem>>, vector<1x32x32xbf16>
    %47 = vector.shape_cast %46 : vector<1x32x32xbf16> to vector<32x32xbf16>
    %cst_42 = arith.constant dense<0.000000e+00> : vector<32x128xf32>
    %48 = tpu.matmul %47, %38, %cst_42 {dimension_numbers = #tpu.dot_dimension_numbers<[1], [0], [0], [1], [0, 0, 1, 1], [], []>} : vector<32x32xbf16>, vector<32x128xbf16>, vector<32x128xf32> -> vector<32x128xf32>
    %49 = arith.truncf %48 : vector<32x128xf32> to vector<32x128xbf16>
    %c5_43 = arith.constant 5 : index
    %c0_44 = arith.constant 0 : index
    %c0_45 = arith.constant 0 : index
    %50 = vector.load %arg2[%c5_43, %c0_44, %c0_45] : memref<24x128x128xbf16, #tpu.memory_space<vmem>>, vector<1x128x128xbf16>
    %51 = vector.shape_cast %50 : vector<1x128x128xbf16> to vector<128x128xbf16>
    %cst_46 = arith.constant dense<0.000000e+00> : vector<32x128xf32>
    %52 = tpu.matmul %49, %51, %cst_46 {dimension_numbers = #tpu.dot_dimension_numbers<[1], [0], [0], [1], [0, 0, 1, 1], [], []>} : vector<32x128xbf16>, vector<128x128xbf16>, vector<32x128xf32> -> vector<32x128xf32>
    %53 = arith.addf %45, %52 : vector<32x128xf32>
    %c6 = arith.constant 6 : index
    %c0_47 = arith.constant 0 : index
    %c0_48 = arith.constant 0 : index
    %54 = vector.load %arg1[%c6, %c0_47, %c0_48] : memref<24x32x32xbf16, #tpu.memory_space<vmem>>, vector<1x32x32xbf16>
    %55 = vector.shape_cast %54 : vector<1x32x32xbf16> to vector<32x32xbf16>
    %cst_49 = arith.constant dense<0.000000e+00> : vector<32x128xf32>
    %56 = tpu.matmul %55, %38, %cst_49 {dimension_numbers = #tpu.dot_dimension_numbers<[1], [0], [0], [1], [0, 0, 1, 1], [], []>} : vector<32x32xbf16>, vector<32x128xbf16>, vector<32x128xf32> -> vector<32x128xf32>
    %57 = arith.truncf %56 : vector<32x128xf32> to vector<32x128xbf16>
    %c6_50 = arith.constant 6 : index
    %c0_51 = arith.constant 0 : index
    %c0_52 = arith.constant 0 : index
    %58 = vector.load %arg2[%c6_50, %c0_51, %c0_52] : memref<24x128x128xbf16, #tpu.memory_space<vmem>>, vector<1x128x128xbf16>
    %59 = vector.shape_cast %58 : vector<1x128x128xbf16> to vector<128x128xbf16>
    %cst_53 = arith.constant dense<0.000000e+00> : vector<32x128xf32>
    %60 = tpu.matmul %57, %59, %cst_53 {dimension_numbers = #tpu.dot_dimension_numbers<[1], [0], [0], [1], [0, 0, 1, 1], [], []>} : vector<32x128xbf16>, vector<128x128xbf16>, vector<32x128xf32> -> vector<32x128xf32>
    %61 = arith.addf %53, %60 : vector<32x128xf32>
    %c7 = arith.constant 7 : index
    %c0_54 = arith.constant 0 : index
    %c0_55 = arith.constant 0 : index
    %62 = vector.load %arg1[%c7, %c0_54, %c0_55] : memref<24x32x32xbf16, #tpu.memory_space<vmem>>, vector<1x32x32xbf16>
    %63 = vector.shape_cast %62 : vector<1x32x32xbf16> to vector<32x32xbf16>
    %cst_56 = arith.constant dense<0.000000e+00> : vector<32x128xf32>
    %64 = tpu.matmul %63, %38, %cst_56 {dimension_numbers = #tpu.dot_dimension_numbers<[1], [0], [0], [1], [0, 0, 1, 1], [], []>} : vector<32x32xbf16>, vector<32x128xbf16>, vector<32x128xf32> -> vector<32x128xf32>
    %65 = arith.truncf %64 : vector<32x128xf32> to vector<32x128xbf16>
    %c7_57 = arith.constant 7 : index
    %c0_58 = arith.constant 0 : index
    %c0_59 = arith.constant 0 : index
    %66 = vector.load %arg2[%c7_57, %c0_58, %c0_59] : memref<24x128x128xbf16, #tpu.memory_space<vmem>>, vector<1x128x128xbf16>
    %67 = vector.shape_cast %66 : vector<1x128x128xbf16> to vector<128x128xbf16>
    %cst_60 = arith.constant dense<0.000000e+00> : vector<32x128xf32>
    %68 = tpu.matmul %65, %67, %cst_60 {dimension_numbers = #tpu.dot_dimension_numbers<[1], [0], [0], [1], [0, 0, 1, 1], [], []>} : vector<32x128xbf16>, vector<128x128xbf16>, vector<32x128xf32> -> vector<32x128xf32>
    %69 = arith.addf %61, %68 : vector<32x128xf32>
    %c1_61 = arith.constant 1 : index
    %c0_62 = arith.constant 0 : index
    %c0_63 = arith.constant 0 : index
    %70 = vector.load %arg3[%c1_61, %c0_62, %c0_63] : memref<7x1x128xf32, #tpu.memory_space<vmem>>, vector<1x1x128xf32>
    %71 = vector.shape_cast %70 : vector<1x1x128xf32> to vector<1x128xf32>
    %72 = vector.broadcast %71 : vector<1x128xf32> to vector<32x128xf32>
    %73 = arith.addf %69, %72 : vector<32x128xf32>
    %cst_64 = arith.constant 0.000000e+00 : f32
    %74 = vector.broadcast %cst_64 : f32 to vector<32x128xf32>
    %75 = arith.maximumf %73, %74 : vector<32x128xf32>
    %76 = arith.truncf %75 : vector<32x128xf32> to vector<32x128xbf16>
    %c8 = arith.constant 8 : index
    %c0_65 = arith.constant 0 : index
    %c0_66 = arith.constant 0 : index
    %77 = vector.load %arg1[%c8, %c0_65, %c0_66] : memref<24x32x32xbf16, #tpu.memory_space<vmem>>, vector<1x32x32xbf16>
    %78 = vector.shape_cast %77 : vector<1x32x32xbf16> to vector<32x32xbf16>
    %cst_67 = arith.constant dense<0.000000e+00> : vector<32x128xf32>
    %79 = tpu.matmul %78, %76, %cst_67 {dimension_numbers = #tpu.dot_dimension_numbers<[1], [0], [0], [1], [0, 0, 1, 1], [], []>} : vector<32x32xbf16>, vector<32x128xbf16>, vector<32x128xf32> -> vector<32x128xf32>
    %80 = arith.truncf %79 : vector<32x128xf32> to vector<32x128xbf16>
    %c8_68 = arith.constant 8 : index
    %c0_69 = arith.constant 0 : index
    %c0_70 = arith.constant 0 : index
    %81 = vector.load %arg2[%c8_68, %c0_69, %c0_70] : memref<24x128x128xbf16, #tpu.memory_space<vmem>>, vector<1x128x128xbf16>
    %82 = vector.shape_cast %81 : vector<1x128x128xbf16> to vector<128x128xbf16>
    %cst_71 = arith.constant dense<0.000000e+00> : vector<32x128xf32>
    %83 = tpu.matmul %80, %82, %cst_71 {dimension_numbers = #tpu.dot_dimension_numbers<[1], [0], [0], [1], [0, 0, 1, 1], [], []>} : vector<32x128xbf16>, vector<128x128xbf16>, vector<32x128xf32> -> vector<32x128xf32>
    %c9 = arith.constant 9 : index
    %c0_72 = arith.constant 0 : index
    %c0_73 = arith.constant 0 : index
    %84 = vector.load %arg1[%c9, %c0_72, %c0_73] : memref<24x32x32xbf16, #tpu.memory_space<vmem>>, vector<1x32x32xbf16>
    %85 = vector.shape_cast %84 : vector<1x32x32xbf16> to vector<32x32xbf16>
    %cst_74 = arith.constant dense<0.000000e+00> : vector<32x128xf32>
    %86 = tpu.matmul %85, %76, %cst_74 {dimension_numbers = #tpu.dot_dimension_numbers<[1], [0], [0], [1], [0, 0, 1, 1], [], []>} : vector<32x32xbf16>, vector<32x128xbf16>, vector<32x128xf32> -> vector<32x128xf32>
    %87 = arith.truncf %86 : vector<32x128xf32> to vector<32x128xbf16>
    %c9_75 = arith.constant 9 : index
    %c0_76 = arith.constant 0 : index
    %c0_77 = arith.constant 0 : index
    %88 = vector.load %arg2[%c9_75, %c0_76, %c0_77] : memref<24x128x128xbf16, #tpu.memory_space<vmem>>, vector<1x128x128xbf16>
    %89 = vector.shape_cast %88 : vector<1x128x128xbf16> to vector<128x128xbf16>
    %cst_78 = arith.constant dense<0.000000e+00> : vector<32x128xf32>
    %90 = tpu.matmul %87, %89, %cst_78 {dimension_numbers = #tpu.dot_dimension_numbers<[1], [0], [0], [1], [0, 0, 1, 1], [], []>} : vector<32x128xbf16>, vector<128x128xbf16>, vector<32x128xf32> -> vector<32x128xf32>
    %91 = arith.addf %83, %90 : vector<32x128xf32>
    %c10 = arith.constant 10 : index
    %c0_79 = arith.constant 0 : index
    %c0_80 = arith.constant 0 : index
    %92 = vector.load %arg1[%c10, %c0_79, %c0_80] : memref<24x32x32xbf16, #tpu.memory_space<vmem>>, vector<1x32x32xbf16>
    %93 = vector.shape_cast %92 : vector<1x32x32xbf16> to vector<32x32xbf16>
    %cst_81 = arith.constant dense<0.000000e+00> : vector<32x128xf32>
    %94 = tpu.matmul %93, %76, %cst_81 {dimension_numbers = #tpu.dot_dimension_numbers<[1], [0], [0], [1], [0, 0, 1, 1], [], []>} : vector<32x32xbf16>, vector<32x128xbf16>, vector<32x128xf32> -> vector<32x128xf32>
    %95 = arith.truncf %94 : vector<32x128xf32> to vector<32x128xbf16>
    %c10_82 = arith.constant 10 : index
    %c0_83 = arith.constant 0 : index
    %c0_84 = arith.constant 0 : index
    %96 = vector.load %arg2[%c10_82, %c0_83, %c0_84] : memref<24x128x128xbf16, #tpu.memory_space<vmem>>, vector<1x128x128xbf16>
    %97 = vector.shape_cast %96 : vector<1x128x128xbf16> to vector<128x128xbf16>
    %cst_85 = arith.constant dense<0.000000e+00> : vector<32x128xf32>
    %98 = tpu.matmul %95, %97, %cst_85 {dimension_numbers = #tpu.dot_dimension_numbers<[1], [0], [0], [1], [0, 0, 1, 1], [], []>} : vector<32x128xbf16>, vector<128x128xbf16>, vector<32x128xf32> -> vector<32x128xf32>
    %99 = arith.addf %91, %98 : vector<32x128xf32>
    %c11 = arith.constant 11 : index
    %c0_86 = arith.constant 0 : index
    %c0_87 = arith.constant 0 : index
    %100 = vector.load %arg1[%c11, %c0_86, %c0_87] : memref<24x32x32xbf16, #tpu.memory_space<vmem>>, vector<1x32x32xbf16>
    %101 = vector.shape_cast %100 : vector<1x32x32xbf16> to vector<32x32xbf16>
    %cst_88 = arith.constant dense<0.000000e+00> : vector<32x128xf32>
    %102 = tpu.matmul %101, %76, %cst_88 {dimension_numbers = #tpu.dot_dimension_numbers<[1], [0], [0], [1], [0, 0, 1, 1], [], []>} : vector<32x32xbf16>, vector<32x128xbf16>, vector<32x128xf32> -> vector<32x128xf32>
    %103 = arith.truncf %102 : vector<32x128xf32> to vector<32x128xbf16>
    %c11_89 = arith.constant 11 : index
    %c0_90 = arith.constant 0 : index
    %c0_91 = arith.constant 0 : index
    %104 = vector.load %arg2[%c11_89, %c0_90, %c0_91] : memref<24x128x128xbf16, #tpu.memory_space<vmem>>, vector<1x128x128xbf16>
    %105 = vector.shape_cast %104 : vector<1x128x128xbf16> to vector<128x128xbf16>
    %cst_92 = arith.constant dense<0.000000e+00> : vector<32x128xf32>
    %106 = tpu.matmul %103, %105, %cst_92 {dimension_numbers = #tpu.dot_dimension_numbers<[1], [0], [0], [1], [0, 0, 1, 1], [], []>} : vector<32x128xbf16>, vector<128x128xbf16>, vector<32x128xf32> -> vector<32x128xf32>
    %107 = arith.addf %99, %106 : vector<32x128xf32>
    %c2_93 = arith.constant 2 : index
    %c0_94 = arith.constant 0 : index
    %c0_95 = arith.constant 0 : index
    %108 = vector.load %arg3[%c2_93, %c0_94, %c0_95] : memref<7x1x128xf32, #tpu.memory_space<vmem>>, vector<1x1x128xf32>
    %109 = vector.shape_cast %108 : vector<1x1x128xf32> to vector<1x128xf32>
    %110 = vector.broadcast %109 : vector<1x128xf32> to vector<32x128xf32>
    %111 = arith.addf %107, %110 : vector<32x128xf32>
    %cst_96 = arith.constant 0.000000e+00 : f32
    %112 = vector.broadcast %cst_96 : f32 to vector<32x128xf32>
    %113 = arith.maximumf %111, %112 : vector<32x128xf32>
    %114 = arith.truncf %113 : vector<32x128xf32> to vector<32x128xbf16>
    %c12 = arith.constant 12 : index
    %c0_97 = arith.constant 0 : index
    %c0_98 = arith.constant 0 : index
    %115 = vector.load %arg1[%c12, %c0_97, %c0_98] : memref<24x32x32xbf16, #tpu.memory_space<vmem>>, vector<1x32x32xbf16>
    %116 = vector.shape_cast %115 : vector<1x32x32xbf16> to vector<32x32xbf16>
    %cst_99 = arith.constant dense<0.000000e+00> : vector<32x128xf32>
    %117 = tpu.matmul %116, %114, %cst_99 {dimension_numbers = #tpu.dot_dimension_numbers<[1], [0], [0], [1], [0, 0, 1, 1], [], []>} : vector<32x32xbf16>, vector<32x128xbf16>, vector<32x128xf32> -> vector<32x128xf32>
    %118 = arith.truncf %117 : vector<32x128xf32> to vector<32x128xbf16>
    %c12_100 = arith.constant 12 : index
    %c0_101 = arith.constant 0 : index
    %c0_102 = arith.constant 0 : index
    %119 = vector.load %arg2[%c12_100, %c0_101, %c0_102] : memref<24x128x128xbf16, #tpu.memory_space<vmem>>, vector<1x128x128xbf16>
    %120 = vector.shape_cast %119 : vector<1x128x128xbf16> to vector<128x128xbf16>
    %cst_103 = arith.constant dense<0.000000e+00> : vector<32x128xf32>
    %121 = tpu.matmul %118, %120, %cst_103 {dimension_numbers = #tpu.dot_dimension_numbers<[1], [0], [0], [1], [0, 0, 1, 1], [], []>} : vector<32x128xbf16>, vector<128x128xbf16>, vector<32x128xf32> -> vector<32x128xf32>
    %c13 = arith.constant 13 : index
    %c0_104 = arith.constant 0 : index
    %c0_105 = arith.constant 0 : index
    %122 = vector.load %arg1[%c13, %c0_104, %c0_105] : memref<24x32x32xbf16, #tpu.memory_space<vmem>>, vector<1x32x32xbf16>
    %123 = vector.shape_cast %122 : vector<1x32x32xbf16> to vector<32x32xbf16>
    %cst_106 = arith.constant dense<0.000000e+00> : vector<32x128xf32>
    %124 = tpu.matmul %123, %114, %cst_106 {dimension_numbers = #tpu.dot_dimension_numbers<[1], [0], [0], [1], [0, 0, 1, 1], [], []>} : vector<32x32xbf16>, vector<32x128xbf16>, vector<32x128xf32> -> vector<32x128xf32>
    %125 = arith.truncf %124 : vector<32x128xf32> to vector<32x128xbf16>
    %c13_107 = arith.constant 13 : index
    %c0_108 = arith.constant 0 : index
    %c0_109 = arith.constant 0 : index
    %126 = vector.load %arg2[%c13_107, %c0_108, %c0_109] : memref<24x128x128xbf16, #tpu.memory_space<vmem>>, vector<1x128x128xbf16>
    %127 = vector.shape_cast %126 : vector<1x128x128xbf16> to vector<128x128xbf16>
    %cst_110 = arith.constant dense<0.000000e+00> : vector<32x128xf32>
    %128 = tpu.matmul %125, %127, %cst_110 {dimension_numbers = #tpu.dot_dimension_numbers<[1], [0], [0], [1], [0, 0, 1, 1], [], []>} : vector<32x128xbf16>, vector<128x128xbf16>, vector<32x128xf32> -> vector<32x128xf32>
    %129 = arith.addf %121, %128 : vector<32x128xf32>
    %c14 = arith.constant 14 : index
    %c0_111 = arith.constant 0 : index
    %c0_112 = arith.constant 0 : index
    %130 = vector.load %arg1[%c14, %c0_111, %c0_112] : memref<24x32x32xbf16, #tpu.memory_space<vmem>>, vector<1x32x32xbf16>
    %131 = vector.shape_cast %130 : vector<1x32x32xbf16> to vector<32x32xbf16>
    %cst_113 = arith.constant dense<0.000000e+00> : vector<32x128xf32>
    %132 = tpu.matmul %131, %114, %cst_113 {dimension_numbers = #tpu.dot_dimension_numbers<[1], [0], [0], [1], [0, 0, 1, 1], [], []>} : vector<32x32xbf16>, vector<32x128xbf16>, vector<32x128xf32> -> vector<32x128xf32>
    %133 = arith.truncf %132 : vector<32x128xf32> to vector<32x128xbf16>
    %c14_114 = arith.constant 14 : index
    %c0_115 = arith.constant 0 : index
    %c0_116 = arith.constant 0 : index
    %134 = vector.load %arg2[%c14_114, %c0_115, %c0_116] : memref<24x128x128xbf16, #tpu.memory_space<vmem>>, vector<1x128x128xbf16>
    %135 = vector.shape_cast %134 : vector<1x128x128xbf16> to vector<128x128xbf16>
    %cst_117 = arith.constant dense<0.000000e+00> : vector<32x128xf32>
    %136 = tpu.matmul %133, %135, %cst_117 {dimension_numbers = #tpu.dot_dimension_numbers<[1], [0], [0], [1], [0, 0, 1, 1], [], []>} : vector<32x128xbf16>, vector<128x128xbf16>, vector<32x128xf32> -> vector<32x128xf32>
    %137 = arith.addf %129, %136 : vector<32x128xf32>
    %c3_118 = arith.constant 3 : index
    %c0_119 = arith.constant 0 : index
    %c0_120 = arith.constant 0 : index
    %138 = vector.load %arg3[%c3_118, %c0_119, %c0_120] : memref<7x1x128xf32, #tpu.memory_space<vmem>>, vector<1x1x128xf32>
    %139 = vector.shape_cast %138 : vector<1x1x128xf32> to vector<1x128xf32>
    %140 = vector.broadcast %139 : vector<1x128xf32> to vector<32x128xf32>
    %141 = arith.addf %137, %140 : vector<32x128xf32>
    %cst_121 = arith.constant 0.000000e+00 : f32
    %142 = vector.broadcast %cst_121 : f32 to vector<32x128xf32>
    %143 = arith.maximumf %141, %142 : vector<32x128xf32>
    %144 = arith.truncf %143 : vector<32x128xf32> to vector<32x128xbf16>
    %c15 = arith.constant 15 : index
    %c0_122 = arith.constant 0 : index
    %c0_123 = arith.constant 0 : index
    %145 = vector.load %arg1[%c15, %c0_122, %c0_123] : memref<24x32x32xbf16, #tpu.memory_space<vmem>>, vector<1x32x32xbf16>
    %146 = vector.shape_cast %145 : vector<1x32x32xbf16> to vector<32x32xbf16>
    %cst_124 = arith.constant dense<0.000000e+00> : vector<32x128xf32>
    %147 = tpu.matmul %146, %144, %cst_124 {dimension_numbers = #tpu.dot_dimension_numbers<[1], [0], [0], [1], [0, 0, 1, 1], [], []>} : vector<32x32xbf16>, vector<32x128xbf16>, vector<32x128xf32> -> vector<32x128xf32>
    %148 = arith.truncf %147 : vector<32x128xf32> to vector<32x128xbf16>
    %c15_125 = arith.constant 15 : index
    %c0_126 = arith.constant 0 : index
    %c0_127 = arith.constant 0 : index
    %149 = vector.load %arg2[%c15_125, %c0_126, %c0_127] : memref<24x128x128xbf16, #tpu.memory_space<vmem>>, vector<1x128x128xbf16>
    %150 = vector.shape_cast %149 : vector<1x128x128xbf16> to vector<128x128xbf16>
    %cst_128 = arith.constant dense<0.000000e+00> : vector<32x128xf32>
    %151 = tpu.matmul %148, %150, %cst_128 {dimension_numbers = #tpu.dot_dimension_numbers<[1], [0], [0], [1], [0, 0, 1, 1], [], []>} : vector<32x128xbf16>, vector<128x128xbf16>, vector<32x128xf32> -> vector<32x128xf32>
    %c16 = arith.constant 16 : index
    %c0_129 = arith.constant 0 : index
    %c0_130 = arith.constant 0 : index
    %152 = vector.load %arg1[%c16, %c0_129, %c0_130] : memref<24x32x32xbf16, #tpu.memory_space<vmem>>, vector<1x32x32xbf16>
    %153 = vector.shape_cast %152 : vector<1x32x32xbf16> to vector<32x32xbf16>
    %cst_131 = arith.constant dense<0.000000e+00> : vector<32x128xf32>
    %154 = tpu.matmul %153, %144, %cst_131 {dimension_numbers = #tpu.dot_dimension_numbers<[1], [0], [0], [1], [0, 0, 1, 1], [], []>} : vector<32x32xbf16>, vector<32x128xbf16>, vector<32x128xf32> -> vector<32x128xf32>
    %155 = arith.truncf %154 : vector<32x128xf32> to vector<32x128xbf16>
    %c16_132 = arith.constant 16 : index
    %c0_133 = arith.constant 0 : index
    %c0_134 = arith.constant 0 : index
    %156 = vector.load %arg2[%c16_132, %c0_133, %c0_134] : memref<24x128x128xbf16, #tpu.memory_space<vmem>>, vector<1x128x128xbf16>
    %157 = vector.shape_cast %156 : vector<1x128x128xbf16> to vector<128x128xbf16>
    %cst_135 = arith.constant dense<0.000000e+00> : vector<32x128xf32>
    %158 = tpu.matmul %155, %157, %cst_135 {dimension_numbers = #tpu.dot_dimension_numbers<[1], [0], [0], [1], [0, 0, 1, 1], [], []>} : vector<32x128xbf16>, vector<128x128xbf16>, vector<32x128xf32> -> vector<32x128xf32>
    %159 = arith.addf %151, %158 : vector<32x128xf32>
    %c17 = arith.constant 17 : index
    %c0_136 = arith.constant 0 : index
    %c0_137 = arith.constant 0 : index
    %160 = vector.load %arg1[%c17, %c0_136, %c0_137] : memref<24x32x32xbf16, #tpu.memory_space<vmem>>, vector<1x32x32xbf16>
    %161 = vector.shape_cast %160 : vector<1x32x32xbf16> to vector<32x32xbf16>
    %cst_138 = arith.constant dense<0.000000e+00> : vector<32x128xf32>
    %162 = tpu.matmul %161, %144, %cst_138 {dimension_numbers = #tpu.dot_dimension_numbers<[1], [0], [0], [1], [0, 0, 1, 1], [], []>} : vector<32x32xbf16>, vector<32x128xbf16>, vector<32x128xf32> -> vector<32x128xf32>
    %163 = arith.truncf %162 : vector<32x128xf32> to vector<32x128xbf16>
    %c17_139 = arith.constant 17 : index
    %c0_140 = arith.constant 0 : index
    %c0_141 = arith.constant 0 : index
    %164 = vector.load %arg2[%c17_139, %c0_140, %c0_141] : memref<24x128x128xbf16, #tpu.memory_space<vmem>>, vector<1x128x128xbf16>
    %165 = vector.shape_cast %164 : vector<1x128x128xbf16> to vector<128x128xbf16>
    %cst_142 = arith.constant dense<0.000000e+00> : vector<32x128xf32>
    %166 = tpu.matmul %163, %165, %cst_142 {dimension_numbers = #tpu.dot_dimension_numbers<[1], [0], [0], [1], [0, 0, 1, 1], [], []>} : vector<32x128xbf16>, vector<128x128xbf16>, vector<32x128xf32> -> vector<32x128xf32>
    %167 = arith.addf %159, %166 : vector<32x128xf32>
    %c4_143 = arith.constant 4 : index
    %c0_144 = arith.constant 0 : index
    %c0_145 = arith.constant 0 : index
    %168 = vector.load %arg3[%c4_143, %c0_144, %c0_145] : memref<7x1x128xf32, #tpu.memory_space<vmem>>, vector<1x1x128xf32>
    %169 = vector.shape_cast %168 : vector<1x1x128xf32> to vector<1x128xf32>
    %170 = vector.broadcast %169 : vector<1x128xf32> to vector<32x128xf32>
    %171 = arith.addf %167, %170 : vector<32x128xf32>
    %172 = arith.addf %171, %113 : vector<32x128xf32>
    %cst_146 = arith.constant 0.000000e+00 : f32
    %173 = vector.broadcast %cst_146 : f32 to vector<32x128xf32>
    %174 = arith.maximumf %172, %173 : vector<32x128xf32>
    %175 = arith.truncf %174 : vector<32x128xf32> to vector<32x128xbf16>
    %c18 = arith.constant 18 : index
    %c0_147 = arith.constant 0 : index
    %c0_148 = arith.constant 0 : index
    %176 = vector.load %arg1[%c18, %c0_147, %c0_148] : memref<24x32x32xbf16, #tpu.memory_space<vmem>>, vector<1x32x32xbf16>
    %177 = vector.shape_cast %176 : vector<1x32x32xbf16> to vector<32x32xbf16>
    %cst_149 = arith.constant dense<0.000000e+00> : vector<32x128xf32>
    %178 = tpu.matmul %177, %175, %cst_149 {dimension_numbers = #tpu.dot_dimension_numbers<[1], [0], [0], [1], [0, 0, 1, 1], [], []>} : vector<32x32xbf16>, vector<32x128xbf16>, vector<32x128xf32> -> vector<32x128xf32>
    %179 = arith.truncf %178 : vector<32x128xf32> to vector<32x128xbf16>
    %c18_150 = arith.constant 18 : index
    %c0_151 = arith.constant 0 : index
    %c0_152 = arith.constant 0 : index
    %180 = vector.load %arg2[%c18_150, %c0_151, %c0_152] : memref<24x128x128xbf16, #tpu.memory_space<vmem>>, vector<1x128x128xbf16>
    %181 = vector.shape_cast %180 : vector<1x128x128xbf16> to vector<128x128xbf16>
    %cst_153 = arith.constant dense<0.000000e+00> : vector<32x128xf32>
    %182 = tpu.matmul %179, %181, %cst_153 {dimension_numbers = #tpu.dot_dimension_numbers<[1], [0], [0], [1], [0, 0, 1, 1], [], []>} : vector<32x128xbf16>, vector<128x128xbf16>, vector<32x128xf32> -> vector<32x128xf32>
    %c19 = arith.constant 19 : index
    %c0_154 = arith.constant 0 : index
    %c0_155 = arith.constant 0 : index
    %183 = vector.load %arg1[%c19, %c0_154, %c0_155] : memref<24x32x32xbf16, #tpu.memory_space<vmem>>, vector<1x32x32xbf16>
    %184 = vector.shape_cast %183 : vector<1x32x32xbf16> to vector<32x32xbf16>
    %cst_156 = arith.constant dense<0.000000e+00> : vector<32x128xf32>
    %185 = tpu.matmul %184, %175, %cst_156 {dimension_numbers = #tpu.dot_dimension_numbers<[1], [0], [0], [1], [0, 0, 1, 1], [], []>} : vector<32x32xbf16>, vector<32x128xbf16>, vector<32x128xf32> -> vector<32x128xf32>
    %186 = arith.truncf %185 : vector<32x128xf32> to vector<32x128xbf16>
    %c19_157 = arith.constant 19 : index
    %c0_158 = arith.constant 0 : index
    %c0_159 = arith.constant 0 : index
    %187 = vector.load %arg2[%c19_157, %c0_158, %c0_159] : memref<24x128x128xbf16, #tpu.memory_space<vmem>>, vector<1x128x128xbf16>
    %188 = vector.shape_cast %187 : vector<1x128x128xbf16> to vector<128x128xbf16>
    %cst_160 = arith.constant dense<0.000000e+00> : vector<32x128xf32>
    %189 = tpu.matmul %186, %188, %cst_160 {dimension_numbers = #tpu.dot_dimension_numbers<[1], [0], [0], [1], [0, 0, 1, 1], [], []>} : vector<32x128xbf16>, vector<128x128xbf16>, vector<32x128xf32> -> vector<32x128xf32>
    %190 = arith.addf %182, %189 : vector<32x128xf32>
    %c20 = arith.constant 20 : index
    %c0_161 = arith.constant 0 : index
    %c0_162 = arith.constant 0 : index
    %191 = vector.load %arg1[%c20, %c0_161, %c0_162] : memref<24x32x32xbf16, #tpu.memory_space<vmem>>, vector<1x32x32xbf16>
    %192 = vector.shape_cast %191 : vector<1x32x32xbf16> to vector<32x32xbf16>
    %cst_163 = arith.constant dense<0.000000e+00> : vector<32x128xf32>
    %193 = tpu.matmul %192, %175, %cst_163 {dimension_numbers = #tpu.dot_dimension_numbers<[1], [0], [0], [1], [0, 0, 1, 1], [], []>} : vector<32x32xbf16>, vector<32x128xbf16>, vector<32x128xf32> -> vector<32x128xf32>
    %194 = arith.truncf %193 : vector<32x128xf32> to vector<32x128xbf16>
    %c20_164 = arith.constant 20 : index
    %c0_165 = arith.constant 0 : index
    %c0_166 = arith.constant 0 : index
    %195 = vector.load %arg2[%c20_164, %c0_165, %c0_166] : memref<24x128x128xbf16, #tpu.memory_space<vmem>>, vector<1x128x128xbf16>
    %196 = vector.shape_cast %195 : vector<1x128x128xbf16> to vector<128x128xbf16>
    %cst_167 = arith.constant dense<0.000000e+00> : vector<32x128xf32>
    %197 = tpu.matmul %194, %196, %cst_167 {dimension_numbers = #tpu.dot_dimension_numbers<[1], [0], [0], [1], [0, 0, 1, 1], [], []>} : vector<32x128xbf16>, vector<128x128xbf16>, vector<32x128xf32> -> vector<32x128xf32>
    %198 = arith.addf %190, %197 : vector<32x128xf32>
    %c5_168 = arith.constant 5 : index
    %c0_169 = arith.constant 0 : index
    %c0_170 = arith.constant 0 : index
    %199 = vector.load %arg3[%c5_168, %c0_169, %c0_170] : memref<7x1x128xf32, #tpu.memory_space<vmem>>, vector<1x1x128xf32>
    %200 = vector.shape_cast %199 : vector<1x1x128xf32> to vector<1x128xf32>
    %201 = vector.broadcast %200 : vector<1x128xf32> to vector<32x128xf32>
    %202 = arith.addf %198, %201 : vector<32x128xf32>
    %cst_171 = arith.constant 0.000000e+00 : f32
    %203 = vector.broadcast %cst_171 : f32 to vector<32x128xf32>
    %204 = arith.maximumf %202, %203 : vector<32x128xf32>
    %205 = arith.truncf %204 : vector<32x128xf32> to vector<32x128xbf16>
    %c21 = arith.constant 21 : index
    %c0_172 = arith.constant 0 : index
    %c0_173 = arith.constant 0 : index
    %206 = vector.load %arg1[%c21, %c0_172, %c0_173] : memref<24x32x32xbf16, #tpu.memory_space<vmem>>, vector<1x32x32xbf16>
    %207 = vector.shape_cast %206 : vector<1x32x32xbf16> to vector<32x32xbf16>
    %cst_174 = arith.constant dense<0.000000e+00> : vector<32x128xf32>
    %208 = tpu.matmul %207, %205, %cst_174 {dimension_numbers = #tpu.dot_dimension_numbers<[1], [0], [0], [1], [0, 0, 1, 1], [], []>} : vector<32x32xbf16>, vector<32x128xbf16>, vector<32x128xf32> -> vector<32x128xf32>
    %209 = arith.truncf %208 : vector<32x128xf32> to vector<32x128xbf16>
    %c21_175 = arith.constant 21 : index
    %c0_176 = arith.constant 0 : index
    %c0_177 = arith.constant 0 : index
    %210 = vector.load %arg2[%c21_175, %c0_176, %c0_177] : memref<24x128x128xbf16, #tpu.memory_space<vmem>>, vector<1x128x128xbf16>
    %211 = vector.shape_cast %210 : vector<1x128x128xbf16> to vector<128x128xbf16>
    %cst_178 = arith.constant dense<0.000000e+00> : vector<32x128xf32>
    %212 = tpu.matmul %209, %211, %cst_178 {dimension_numbers = #tpu.dot_dimension_numbers<[1], [0], [0], [1], [0, 0, 1, 1], [], []>} : vector<32x128xbf16>, vector<128x128xbf16>, vector<32x128xf32> -> vector<32x128xf32>
    %c22 = arith.constant 22 : index
    %c0_179 = arith.constant 0 : index
    %c0_180 = arith.constant 0 : index
    %213 = vector.load %arg1[%c22, %c0_179, %c0_180] : memref<24x32x32xbf16, #tpu.memory_space<vmem>>, vector<1x32x32xbf16>
    %214 = vector.shape_cast %213 : vector<1x32x32xbf16> to vector<32x32xbf16>
    %cst_181 = arith.constant dense<0.000000e+00> : vector<32x128xf32>
    %215 = tpu.matmul %214, %205, %cst_181 {dimension_numbers = #tpu.dot_dimension_numbers<[1], [0], [0], [1], [0, 0, 1, 1], [], []>} : vector<32x32xbf16>, vector<32x128xbf16>, vector<32x128xf32> -> vector<32x128xf32>
    %216 = arith.truncf %215 : vector<32x128xf32> to vector<32x128xbf16>
    %c22_182 = arith.constant 22 : index
    %c0_183 = arith.constant 0 : index
    %c0_184 = arith.constant 0 : index
    %217 = vector.load %arg2[%c22_182, %c0_183, %c0_184] : memref<24x128x128xbf16, #tpu.memory_space<vmem>>, vector<1x128x128xbf16>
    %218 = vector.shape_cast %217 : vector<1x128x128xbf16> to vector<128x128xbf16>
    %cst_185 = arith.constant dense<0.000000e+00> : vector<32x128xf32>
    %219 = tpu.matmul %216, %218, %cst_185 {dimension_numbers = #tpu.dot_dimension_numbers<[1], [0], [0], [1], [0, 0, 1, 1], [], []>} : vector<32x128xbf16>, vector<128x128xbf16>, vector<32x128xf32> -> vector<32x128xf32>
    %220 = arith.addf %212, %219 : vector<32x128xf32>
    %c23 = arith.constant 23 : index
    %c0_186 = arith.constant 0 : index
    %c0_187 = arith.constant 0 : index
    %221 = vector.load %arg1[%c23, %c0_186, %c0_187] : memref<24x32x32xbf16, #tpu.memory_space<vmem>>, vector<1x32x32xbf16>
    %222 = vector.shape_cast %221 : vector<1x32x32xbf16> to vector<32x32xbf16>
    %cst_188 = arith.constant dense<0.000000e+00> : vector<32x128xf32>
    %223 = tpu.matmul %222, %205, %cst_188 {dimension_numbers = #tpu.dot_dimension_numbers<[1], [0], [0], [1], [0, 0, 1, 1], [], []>} : vector<32x32xbf16>, vector<32x128xbf16>, vector<32x128xf32> -> vector<32x128xf32>
    %224 = arith.truncf %223 : vector<32x128xf32> to vector<32x128xbf16>
    %c23_189 = arith.constant 23 : index
    %c0_190 = arith.constant 0 : index
    %c0_191 = arith.constant 0 : index
    %225 = vector.load %arg2[%c23_189, %c0_190, %c0_191] : memref<24x128x128xbf16, #tpu.memory_space<vmem>>, vector<1x128x128xbf16>
    %226 = vector.shape_cast %225 : vector<1x128x128xbf16> to vector<128x128xbf16>
    %cst_192 = arith.constant dense<0.000000e+00> : vector<32x128xf32>
    %227 = tpu.matmul %224, %226, %cst_192 {dimension_numbers = #tpu.dot_dimension_numbers<[1], [0], [0], [1], [0, 0, 1, 1], [], []>} : vector<32x128xbf16>, vector<128x128xbf16>, vector<32x128xf32> -> vector<32x128xf32>
    %228 = arith.addf %220, %227 : vector<32x128xf32>
    %c6_193 = arith.constant 6 : index
    %c0_194 = arith.constant 0 : index
    %c0_195 = arith.constant 0 : index
    %229 = vector.load %arg3[%c6_193, %c0_194, %c0_195] : memref<7x1x128xf32, #tpu.memory_space<vmem>>, vector<1x1x128xf32>
    %230 = vector.shape_cast %229 : vector<1x1x128xf32> to vector<1x128xf32>
    %231 = vector.broadcast %230 : vector<1x128xf32> to vector<32x128xf32>
    %232 = arith.addf %228, %231 : vector<32x128xf32>
    %233 = arith.addf %232, %174 : vector<32x128xf32>
    %cst_196 = arith.constant 0.000000e+00 : f32
    %234 = vector.broadcast %cst_196 : f32 to vector<32x128xf32>
    %235 = arith.maximumf %233, %234 : vector<32x128xf32>
    %236 = vector.extract_strided_slice %37 {offsets = [0, 0], sizes = [16, 128], strides = [1, 1]} : vector<32x128xf32> to vector<16x128xf32>
    %c0_197 = arith.constant 0 : index
    %c0_198 = arith.constant 0 : index
    %237 = vector.load %arg4[%c0_197, %c0_198] : memref<16x128xf32, #tpu.memory_space<vmem>>, vector<16x128xf32>
    tpu.vector_store %arg4[%c0_197, %c0_198], %236 {strides = array<i32>} : memref<16x128xf32, #tpu.memory_space<vmem>>, vector<16x128xf32>,
    %238 = vector.extract_strided_slice %75 {offsets = [0, 0], sizes = [8, 128], strides = [1, 1]} : vector<32x128xf32> to vector<8x128xf32>
    %c0_199 = arith.constant 0 : index
    %c0_200 = arith.constant 0 : index
    %239 = vector.load %arg5[%c0_199, %c0_200] : memref<8x128xf32, #tpu.memory_space<vmem>>, vector<8x128xf32>
    tpu.vector_store %arg5[%c0_199, %c0_200], %238 {strides = array<i32>} : memref<8x128xf32, #tpu.memory_space<vmem>>, vector<8x128xf32>,
    %240 = vector.extract_strided_slice %235 {offsets = [0, 0], sizes = [8, 128], strides = [1, 1]} : vector<32x128xf32> to vector<8x128xf32>
    %c0_201 = arith.constant 0 : index
    %c0_202 = arith.constant 0 : index
    %241 = vector.load %arg6[%c0_201, %c0_202] : memref<8x128xf32, #tpu.memory_space<vmem>>, vector<8x128xf32>
    tpu.vector_store %arg6[%c0_201, %c0_202], %240 {strides = array<i32>} : memref<8x128xf32, #tpu.memory_space<vmem>>, vector<8x128xf32>,
    return
  }
}

</mosaic_0001>

<bundles_post_ra>
// kernel: _lambda_.1
= control target key start
LH: loop header
LB: loop body
LE: loop exit
PB: predicated region body
PF: predicated region fallthrough
CT: control target
= control target key end

     0   :  { %12 = vsyncpa [#allocation3], 0  ;;  %s6413_s21 = smov [#allocation2]   ;;  %s6815_s0 = inlined_call_operand.vmem [shape: bf16[32,128], index: 0, kind: input, shape index: {}]   ;;  %s6816_s1 = inlined_call_operand.vmem [shape: bf16[24,32,32], index: 1, kind: input, shape index: {}]   ;;  %s6817_s2 = inlined_call_operand.hbm [shape: bf16[24,128,128], index: 2, kind: input, shape index: {}]   ;;  %s6818_s3 = inlined_call_operand.vmem [shape: f32[7,1,128], index: 3, kind: input, shape index: {}]   ;;  %s6819_s4 = inlined_call_operand.vmem [shape: f32[16,128], index: 4, kind: output, shape index: {0}]   ;;  %s6820_s5 = inlined_call_operand.vmem [shape: f32[8,128], index: 5, kind: output, shape index: {1}]   ;;  %s6821_s6 = inlined_call_operand.vmem [shape: f32[8,128], index: 6, kind: output, shape index: {2}]  }
   0x1   :  { %s22_s22 = sshll.u32 %s6413_s21, 4  ;;  %s6389_s25 = scalar_lea.hbm %s6817_s2, 24576  ;;  %s23_s22 = int_to_ptr.vmem [resolvable:$true] %s22_s22 }
   0x2   :  { %p6390_p0 = scmp.ne.s32.totalorder %s6817_s2, %s6389_s25  ;;  %p6393_p1 = scmp.lt.u32.totalorder %s6389_s25, %s6817_s2 }
   0x4   :  { %p6395_p2 = pnand %p6393_p1, %p6390_p0 }
   0x6   :  { %6398 = shalt.err (!%p6395_p2)
}
   0x7   :  { %s6399_s30 = scalar_lea.vmem %s23_s22, 24576  ;;  %p6404_p4 = scmp.lt.s32.totalorder %s23_s22, %s23_s22 }
   0x8   :  { %p6400_p3 = scmp.ne.s32.totalorder %s23_s22, %s6399_s30  ;;  %p6405_p5 = scmp.lt.s32.totalorder %s6399_s30, %s6399_s30 }
   0xa   :  { %p6406_p6 = por %p6405_p5, %p6404_p4 }
   0xc   :  { %p6407_p7 = pnand %p6406_p6, %p6400_p3 }
   0xe   :  { %6410 = shalt.err (!%p6407_p7)
}
   0xf   :  { %s6414_s7 = smov 64   ;;  %s6415_s8 = smov 4  }
  0x10   :  { %28 = dma.hbm_to_vmem [thread:$0]  %s6817_s2, 24576, %s23_s22, [#allocation3], %s6414_s7, %s6414_s7, %s6415_s8  }
  0x11   :  { %6411 = dma.done.wait [#allocation3], 24576  }
  0x12   :  { %6412 = vsyncadd [#allocation3], 4294942720  ;;  %v6147_v0 = vld [vmem:[%s6815_s0] sm:$0xff]   ;;  %v6148_v1 = vld [vmem:[%s6815_s0 + $0x8] sm:$0xff]   ;;  %vm65_vm0 = vcmask 261120  }
  0x13   :  { %5412 = vmatprep.subr.bf16.mxu1 %v6147_v0  ;;  %v6149_v2 = vld [vmem:[%s6816_s1] sm:$0xff]   ;;  %v6150_v3 = vld [vmem:[%s6816_s1 + $0x8] sm:$0xff]   ;;  %v6151_v4 = vld [vmem:[%s6816_s1 + $0x10] sm:$0xff]  }
  0x14   :  { %5413 = vmatpush3.bf16.msra.mxu1 %v6147_v0  ;;  %5416 = vmatprep.mubr.msk.bf16.mxu1 %vm65_vm0, %v6149_v2  ;;  %v6157_v5 = vld [vmem:[#allocation2 + $0x40] sm:$0xff]   ;;  %v6158_v6 = vld [vmem:[#allocation2 + $0x48] sm:$0xff]   ;;  %v6152_v7 = vld [vmem:[%s6816_s1 + $0x18] sm:$0xff]  }
  0x15   :  { %5414 = vmatprep.subr.bf16.mxu1 %v6148_v1  ;;  %5428 = vmatprep.subr.bf16.mxu0 %v6157_v5  ;;  %v6153_v8 = vld [vmem:[%s6816_s1 + $0x20] sm:$0xff]   ;;  %v6159_v9 = vld [vmem:[#allocation2 + $0x50] sm:$0xff]   ;;  %v6160_v10 = vld [vmem:[#allocation2 + $0x58] sm:$0xff]  }
  0x16   :  { %5429 = vmatpush3.bf16.msra.mxu0 %v6157_v5  ;;  %v6154_v11 = vld [vmem:[%s6816_s1 + $0x28] sm:$0xff]   ;;  %v6161_v12 = vld [vmem:[#allocation2 + $0x60] sm:$0xff]   ;;  %v6155_v13 = vld [vmem:[%s6816_s1 + $0x30] sm:$0xff]  }
  0x17   :  { %5430 = vmatprep.subr.bf16.mxu0 %v6158_v6  ;;  %v6156_v14 = vld [vmem:[%s6816_s1 + $0x38] sm:$0xff]   ;;  %v6162_v15 = vld [vmem:[#allocation2 + $0x68] sm:$0xff]   ;;  %v6163_v16 = vld [vmem:[#allocation2 + $0x70] sm:$0xff]  }
  0x18   :  { %5415 = vmatpush3.bf16.msra.mxu1 %v6148_v1  ;;  %v6164_v17 = vld [vmem:[#allocation2 + $0x78] sm:$0xff]   ;;  %v6165_v18 = vld [vmem:[#allocation2] sm:$0xff]   ;;  %v6166_v31 = vld [vmem:[#allocation2 + $0x8] sm:$0xff]  }
  0x19   :  { %5420 = vmatprep.subr.bf16.mxu1 %v6147_v0  ;;  %v6167_v33 = vld [vmem:[#allocation2 + $0x10] sm:$0xff]   ;;  %v6168_v39 = vld [vmem:[#allocation2 + $0x18] sm:$0xff]   ;;  %v6169_v41 = vld [vmem:[#allocation2 + $0x20] sm:$0xff]  }
  0x1a   :  { %5431 = vmatpush3.bf16.msra.mxu0 %v6158_v6  ;;  %v6170_v47 = vld [vmem:[#allocation2 + $0x28] sm:$0xff]   ;;  %v6171_v48 = vld [vmem:[#allocation2 + $0x30] sm:$0xff]   ;;  %v6172_v49 = vld [vmem:[#allocation2 + $0x38] sm:$0xff]  }
  0x1b   :  { %5417 = vmatmul.mubr.msk.bf16.vlgmr.msra.gmra.mrb[0].mxu1 %vm65_vm0, %v6150_v3  ;;  %5432 = vmatprep.subr.bf16.mxu0 %v6159_v9  ;;  %v6173_v50 = vld [vmem:[#allocation2 + $0x80] sm:$0xff]   ;;  %v6174_v51 = vld [vmem:[#allocation2 + $0x88] sm:$0xff]   ;;  %v6175_v52 = vld [vmem:[#allocation2 + $0x90] sm:$0xff]  }
  0x1c   :  { %5421 = vmatpush3.bf16.msra.mxu1 %v6147_v0  ;;  %5424 = vmatprep.mubr.msk.bf16.mxu1 %vm65_vm0, %v6151_v4  ;;  %v6176_v53 = vld [vmem:[#allocation2 + $0x98] sm:$0xff]   ;;  %v6177_v54 = vld [vmem:[#allocation2 + $0xa0] sm:$0xff]   ;;  %v6178_v55 = vld [vmem:[#allocation2 + $0xa8] sm:$0xff]  }
  0x1d   :  { %5422 = vmatprep.subr.bf16.mxu1 %v6148_v1  ;;  %v6179_v56 = vld [vmem:[#allocation2 + $0xb0] sm:$0xff]   ;;  %v6180_v57 = vld [vmem:[#allocation2 + $0xb8] sm:$0xff]   ;;  %v6181_v58 = vld [vmem:[#allocation2 + $0xc0] sm:$0xff]  }
  0x1e   :  { %5433 = vmatpush3.bf16.msra.mxu0 %v6159_v9  ;;  %v6182_v59 = vld [vmem:[#allocation2 + $0xc8] sm:$0xff]   ;;  %v6183_v60 = vld [vmem:[#allocation2 + $0xd0] sm:$0xff]   ;;  %v6184_v61 = vld [vmem:[#allocation2 + $0xd8] sm:$0xff]  }
  0x1f   :  { %5434 = vmatprep.subr.bf16.mxu0 %v6160_v10  ;;  %v6185_v62 = vld [vmem:[#allocation2 + $0xe0] sm:$0xff]   ;;  %v6186_v63 = vld [vmem:[#allocation2 + $0xe8] sm:$0xff]  }
  0x20   :  { %5423 = vmatpush3.bf16.msra.mxu1 %v6148_v1  ;;  %v6189_v2 = vld [vmem:[%s6816_s1 + $0x40] sm:$0xff]  }
  0x21   :  { %5468 = vmatprep.subr.bf16.mxu1 %v6147_v0  ;;  %v4743_v3 = vld [vmem:[%s6818_s3] ss:$0 sm:$0xff] }
  0x22   :  { %5435 = vmatpush3.bf16.msra.mxu0 %v6160_v10 }
  0x23   :  { %5425 = vmatmul.mubr.msk.bf16.vlgmr.msra.gmra.mrb[4].mxu1 %vm65_vm0, %v6152_v7  ;;  %5436 = vmatprep.subr.bf16.mxu0 %v6161_v12 }
  0x24   :  { %5469 = vmatpush3.bf16.msra.mxu1 %v6147_v0  ;;  %5472 = vmatprep.mubr.msk.bf16.mxu1 %vm65_vm0, %v6153_v8 }
  0x25   :  { %5470 = vmatprep.subr.bf16.mxu1 %v6148_v1 }
  0x26   :  { %5437 = vmatpush3.bf16.msra.mxu0 %v6161_v12 }
  0x27   :  { %5438 = vmatprep.subr.bf16.mxu0 %v6162_v15 }
  0x28   :  { %5471 = vmatpush3.bf16.msra.mxu1 %v6148_v1 }
  0x29   :  { %5496 = vmatprep.subr.bf16.mxu1 %v6147_v0 }
  0x2a   :  { %5439 = vmatpush3.bf16.msra.mxu0 %v6162_v15 }
  0x2b   :  { %5473 = vmatmul.mubr.msk.bf16.vlgmr.msra.gmra.mrb[8].mxu1 %vm65_vm0, %v6154_v11  ;;  %5440 = vmatprep.subr.bf16.mxu0 %v6163_v16 }
  0x2c   :  { %5497 = vmatpush3.bf16.msra.mxu1 %v6147_v0  ;;  %5500 = vmatprep.mubr.msk.bf16.mxu1 %vm65_vm0, %v6155_v13  ;;  %v6187_v0 = vld [vmem:[#allocation2 + $0xf0] sm:$0xff]  }
  0x2d   :  { %5498 = vmatprep.subr.bf16.mxu1 %v6148_v1 }
  0x2e   :  { %5441 = vmatpush3.bf16.msra.mxu0 %v6163_v16 }
  0x2f   :  { %5442 = vmatprep.subr.bf16.mxu0 %v6164_v17 }
  0x30   :  { %5499 = vmatpush3.bf16.msra.mxu1 %v6148_v1  ;;  %v6188_v1 = vld [vmem:[#allocation2 + $0xf8] sm:$0xff]  }
  0x32   :  { %5443 = vmatpush3.bf16.msra.mxu0 %v6164_v17 }
  0x33   :  { %5501 = vmatmul.mubr.msk.bf16.vlgmr.msra.gmra.mrb[12].mxu1 %vm65_vm0, %v6156_v14  ;;  %5448 = vmatprep.subr.bf16.mxu0 %v6165_v18 }
  0x34   :  { %5528 = vmatprep.mubr.msk.bf16.mxu1 %vm65_vm0, %v6189_v2  ;;  %v6221_v2 = vld [vmem:[#allocation2 + $0x1c0] sm:$0xff]  }
  0xee   :  { %v5418_v19 = vpop.f32.mrb[0].mxu1 }
  0xef   :  { %v106_v20 = vpop.f32.mrb[1].mxu1 }
  0xf0   :  { %v5419_v21 = vpop.f32.mrb[2].mxu1 }
  0xf1   :  { %v122_v22 = vpack.c.bf16 %v5419_v21, %v5418_v19  ;;  %v109_v23 = vpop.f32.mrb[3].mxu1  ;;  %v6191_v19 = vld [vmem:[%s6816_s1 + $0x50] sm:$0xff]   ;;  %v6192_v21 = vld [vmem:[%s6816_s1 + $0x58] sm:$0xff]  }
  0xf2   :  { %v121_v24 = vpack.c.bf16 %v109_v23, %v106_v20  ;;  %v6193_v20 = vld [vmem:[#allocation2 + $0x140] sm:$0xff]   ;;  %v6195_v23 = vld [vmem:[#allocation2 + $0x150] sm:$0xff]  }
  0xf6   :  { %v5426_v25 = vpop.f32.mrb[4].mxu1 }
  0xf7   :  { %v194_v26 = vpop.f32.mrb[5].mxu1 }
  0xf8   :  { %v5427_v27 = vpop.f32.mrb[6].mxu1 }
  0xf9   :  { %v210_v28 = vpack.c.bf16 %v5427_v27, %v5426_v25  ;;  %v197_v29 = vpop.f32.mrb[7].mxu1  ;;  %v6197_v25 = vld [vmem:[#allocation2 + $0x160] sm:$0xff]   ;;  %v6199_v27 = vld [vmem:[#allocation2 + $0x170] sm:$0xff]  }
  0xfa   :  { %v209_v30 = vpack.c.bf16 %v197_v29, %v194_v26  ;;  %v6198_v26 = vld [vmem:[#allocation2 + $0x168] sm:$0xff]   ;;  %v6201_v29 = vld [vmem:[#allocation2 + $0x100] sm:$0xff]  }
  0xfc   :  { %5444 = vmatprep.mubr.bf16.mxu0 %v209_v30 }
  0xfd   :  { %5445 = vmatmul.mubr.bf16.vlgmr.msra.gmra.mrb[0].mxu0 %v210_v28  ;;  %v6200_v28 = vld [vmem:[#allocation2 + $0x178] sm:$0xff]  }
  0xfe   :  { %5449 = vmatpush3.bf16.msra.mxu0 %v6165_v18  ;;  %5464 = vmatprep.mubr.bf16.mxu0 %v121_v24  ;;  %v5474_v32 = vpop.f32.mrb[8].mxu1  ;;  %v6190_v18 = vld [vmem:[%s6816_s1 + $0x48] sm:$0xff]   ;;  %v6196_v24 = vld [vmem:[#allocation2 + $0x158] sm:$0xff]  }
  0xff   :  { %5450 = vmatprep.subr.bf16.mxu0 %v6166_v31  ;;  %v477_v34 = vpop.f32.mrb[9].mxu1 }
 0x100   :  { %v5475_v35 = vpop.f32.mrb[10].mxu1 }
 0x101   :  { %v493_v36 = vpack.c.bf16 %v5475_v35, %v5474_v32  ;;  %v480_v37 = vpop.f32.mrb[11].mxu1 }
 0x102   :  { %5451 = vmatpush3.bf16.msra.mxu0 %v6166_v31  ;;  %v492_v38 = vpack.c.bf16 %v480_v37, %v477_v34 }
 0x103   :  { %5452 = vmatprep.subr.bf16.mxu0 %v6167_v33 }
 0x106   :  { %5453 = vmatpush3.bf16.msra.mxu0 %v6167_v33  ;;  %v6501_v40 = vpop.f32.mrb[12].mxu1 }
 0x107   :  { %5454 = vmatprep.subr.bf16.mxu0 %v6168_v39  ;;  %v667_v42 = vpop.f32.mrb[13].mxu1 }
 0x108   :  { %v6503_v43 = vpop.f32.mrb[14].mxu1 }
 0x109   :  { %v683_v44 = vpack.c.bf16 %v6503_v43, %v6501_v40  ;;  %v670_v45 = vpop.f32.mrb[15].mxu1  ;;  %v6203_v43 = vld [vmem:[#allocation2 + $0x110] sm:$0xff]  }
 0x10a   :  { %5455 = vmatpush3.bf16.msra.mxu0 %v6168_v39  ;;  %v682_v46 = vpack.c.bf16 %v670_v45, %v667_v42  ;;  %v6202_v42 = vld [vmem:[#allocation2 + $0x108] sm:$0xff]   ;;  %v6205_v45 = vld [vmem:[#allocation2 + $0x120] sm:$0xff]  }
 0x10b   :  { %5456 = vmatprep.subr.bf16.mxu0 %v6169_v41 }
 0x10e   :  { %5457 = vmatpush3.bf16.msra.mxu0 %v6169_v41 }
 0x10f   :  { %5458 = vmatprep.subr.bf16.mxu0 %v6170_v47 }
 0x112   :  { %5459 = vmatpush3.bf16.msra.mxu0 %v6170_v47  ;;  %v6207_v47 = vld [vmem:[#allocation2 + $0x130] sm:$0xff]  }
 0x113   :  { %5460 = vmatprep.subr.bf16.mxu0 %v6171_v48 }
 0x116   :  { %5461 = vmatpush3.bf16.msra.mxu0 %v6171_v48  ;;  %v6208_v48 = vld [vmem:[#allocation2 + $0x138] sm:$0xff]  }
 0x117   :  { %5462 = vmatprep.subr.bf16.mxu0 %v6172_v49 }
 0x11a   :  { %5463 = vmatpush3.bf16.msra.mxu0 %v6172_v49  ;;  %v6209_v49 = vld [vmem:[%s6816_s1 + $0x60] sm:$0xff]  }
 0x11b   :  { %5476 = vmatprep.subr.bf16.mxu0 %v6173_v50 }
 0x11d   :  { %5465 = vmatmul.mubr.bf16.vlgmr.msra.gmra.mrb[0].mxu0 %v122_v22  ;;  %v6194_v22 = vld [vmem:[#allocation2 + $0x148] sm:$0xff]  }
 0x11e   :  { %5477 = vmatpush3.bf16.msra.mxu0 %v6173_v50  ;;  %5492 = vmatprep.mubr.bf16.mxu0 %v492_v38  ;;  %v6211_v50 = vld [vmem:[#allocation2 + $0x180] sm:$0xff]  }
 0x11f   :  { %5478 = vmatprep.subr.bf16.mxu0 %v6174_v51 }
 0x122   :  { %5479 = vmatpush3.bf16.msra.mxu0 %v6174_v51  ;;  %v6210_v51 = vld [vmem:[%s6816_s1 + $0x68] sm:$0xff]  }
 0x123   :  { %5480 = vmatprep.subr.bf16.mxu0 %v6175_v52 }
 0x126   :  { %5481 = vmatpush3.bf16.msra.mxu0 %v6175_v52  ;;  %v6212_v52 = vld [vmem:[#allocation2 + $0x188] sm:$0xff]  }
 0x127   :  { %5482 = vmatprep.subr.bf16.mxu0 %v6176_v53 }
 0x12a   :  { %5483 = vmatpush3.bf16.msra.mxu0 %v6176_v53  ;;  %v6213_v53 = vld [vmem:[#allocation2 + $0x190] sm:$0xff]  }
 0x12b   :  { %5484 = vmatprep.subr.bf16.mxu0 %v6177_v54 }
 0x12e   :  { %5485 = vmatpush3.bf16.msra.mxu0 %v6177_v54  ;;  %v6214_v54 = vld [vmem:[#allocation2 + $0x198] sm:$0xff]  }
 0x12f   :  { %5486 = vmatprep.subr.bf16.mxu0 %v6178_v55 }
 0x132   :  { %5487 = vmatpush3.bf16.msra.mxu0 %v6178_v55  ;;  %v6215_v55 = vld [vmem:[#allocation2 + $0x1a0] sm:$0xff]  }
 0x133   :  { %5488 = vmatprep.subr.bf16.mxu0 %v6179_v56 }
 0x136   :  { %5489 = vmatpush3.bf16.msra.mxu0 %v6179_v56  ;;  %v6216_v56 = vld [vmem:[#allocation2 + $0x1a8] sm:$0xff]  }
 0x137   :  { %5490 = vmatprep.subr.bf16.mxu0 %v6180_v57 }
 0x13a   :  { %5491 = vmatpush3.bf16.msra.mxu0 %v6180_v57  ;;  %v6217_v57 = vld [vmem:[#allocation2 + $0x1b0] sm:$0xff]  }
 0x13b   :  { %5504 = vmatprep.subr.bf16.mxu0 %v6181_v58 }
 0x13d   :  { %5493 = vmatmul.mubr.bf16.vlgmr.msra.gmra.mrb[0].mxu0 %v493_v36 }
 0x13e   :  { %5505 = vmatpush3.bf16.msra.mxu0 %v6181_v58  ;;  %5520 = vmatprep.mubr.bf16.mxu0 %v682_v46  ;;  %v6206_v46 = vld [vmem:[#allocation2 + $0x128] sm:$0xff]   ;;  %v6218_v58 = vld [vmem:[#allocation2 + $0x1b8] sm:$0xff]  }
 0x13f   :  { %5506 = vmatprep.subr.bf16.mxu0 %v6182_v59 }
 0x142   :  { %5507 = vmatpush3.bf16.msra.mxu0 %v6182_v59 }
 0x143   :  { %5508 = vmatprep.subr.bf16.mxu0 %v6183_v60 }
 0x146   :  { %5509 = vmatpush3.bf16.msra.mxu0 %v6183_v60 }
 0x147   :  { %5510 = vmatprep.subr.bf16.mxu0 %v6184_v61 }
 0x14a   :  { %5511 = vmatpush3.bf16.msra.mxu0 %v6184_v61 }
 0x14b   :  { %5512 = vmatprep.subr.bf16.mxu0 %v6185_v62 }
 0x14e   :  { %5513 = vmatpush3.bf16.msra.mxu0 %v6185_v62 }
 0x14f   :  { %5514 = vmatprep.subr.bf16.mxu0 %v6186_v63 }
 0x152   :  { %5515 = vmatpush3.bf16.msra.mxu0 %v6186_v63 }
 0x153   :  { %5516 = vmatprep.subr.bf16.mxu0 %v6187_v0 }
 0x156   :  { %5517 = vmatpush3.bf16.msra.mxu0 %v6187_v0 }
 0x157   :  { %5518 = vmatprep.subr.bf16.mxu0 %v6188_v1 }
 0x15a   :  { %5519 = vmatpush3.bf16.msra.mxu0 %v6188_v1  ;;  %v6219_v1 = vld [vmem:[%s6816_s1 + $0x70] sm:$0xff]  }
 0x15d   :  { %5521 = vmatmul.mubr.bf16.vlgmr.msra.gmra.mrb[0].mxu0 %v683_v44  ;;  %v6204_v44 = vld [vmem:[#allocation2 + $0x118] sm:$0xff]  }
 0x230   :  { %v5522_v4 = vpop.f32.mrb[0].mxu0 }
 0x231   :  { %v811_v5 = vadd.f32 %v5522_v4, %v4743_v3  ;;  %v783_v6 = vpop.f32.mrb[1].mxu0  ;;  %v6222_v4 = vld [vmem:[#allocation2 + $0x1c8] sm:$0xff]  }
 0x232   :  { %v809_v7 = vadd.f32 %v4743_v3, %v783_v6  ;;  %v5523_v8 = vpop.f32.mrb[2].mxu0  ;;  %v6224_v6 = vld [vmem:[#allocation2 + $0x1d8] sm:$0xff]  }
 0x233   :  { %v812_v9 = vadd.f32 %v5523_v8, %v4743_v3  ;;  %v786_v10 = vpop.f32.mrb[3].mxu0  ;;  %v815_v13 = vmax.f32 %v811_v5, 0.0  ;;  %v6223_v5 = vld [vmem:[#allocation2 + $0x1d0] sm:$0xff]   ;;  %v6226_v8 = vld [vmem:[#allocation2 + $0x1e8] sm:$0xff]  }
 0x234   :  { %v813_v11 = vmax.f32 %v809_v7, 0.0  ;;  %v810_v12 = vadd.f32 %v4743_v3, %v786_v10  ;;  %v6220_v3 = vld [vmem:[%s6816_s1 + $0x78] sm:$0xff]   ;;  %v6225_v7 = vld [vmem:[#allocation2 + $0x1e0] sm:$0xff]  }
 0x235   :  { %v816_v14 = vmax.f32 %v812_v9, 0.0  ;;  %v6227_v9 = vld [vmem:[#allocation2 + $0x1f0] sm:$0xff]   ;;  %v6228_v10 = vld [vmem:[#allocation2 + $0x1f8] sm:$0xff]  }
 0x236   :  { %4664 = vst [vmem:[%s6819_s4] sm:$0xff] %v813_v11  ;;  %v814_v15 = vmax.f32 %v810_v12, 0.0 }
 0x237   :  { %v6520_v16 = vpack.c.bf16 %v816_v14, %v815_v13 }
 0x238   :  { %v6522_v17 = vpack.c.bf16 %v814_v15, %v813_v11  ;;  %4665 = vst [vmem:[%s6819_s4 + $0x8] sm:$0xff] %v814_v15 }
 0x23a   :  { %5524 = vmatprep.subr.bf16.mxu1 %v6522_v17 }
 0x23b   :  { %5525 = vmatpush3.bf16.msra.mxu1 %v6522_v17 }
 0x23c   :  { %5526 = vmatprep.subr.bf16.mxu1 %v6520_v16 }
 0x23f   :  { %5527 = vmatpush3.bf16.msra.mxu1 %v6520_v16 }
 0x240   :  { %5532 = vmatprep.subr.bf16.mxu1 %v6522_v17 }
 0x242   :  { %5529 = vmatmul.mubr.msk.bf16.vlgmr.msra.gmra.mrb[16].mxu1 %vm65_vm0, %v6190_v18  ;;  %v6231_v18 = vld [vmem:[%s6816_s1 + $0xa0] sm:$0xff]  }
 0x243   :  { %5533 = vmatpush3.bf16.msra.mxu1 %v6522_v17  ;;  %5536 = vmatprep.mubr.msk.bf16.mxu1 %vm65_vm0, %v6191_v19  ;;  %v4809_v19 = vld [vmem:[%s6818_s3 + $0x1] ss:$0 sm:$0xff] }
 0x244   :  { %5534 = vmatprep.subr.bf16.mxu1 %v6520_v16 }
 0x247   :  { %5535 = vmatpush3.bf16.msra.mxu1 %v6520_v16 }
 0x248   :  { %5540 = vmatprep.subr.bf16.mxu1 %v6193_v20 }
 0x24a   :  { %5537 = vmatmul.mubr.msk.bf16.vlgmr.msra.gmra.mrb[20].mxu1 %vm65_vm0, %v6192_v21 }
 0x24b   :  { %5541 = vmatpush3.bf16.msra.mxu1 %v6193_v20 }
 0x24c   :  { %5542 = vmatprep.subr.bf16.mxu1 %v6194_v22 }
 0x24f   :  { %5543 = vmatpush3.bf16.msra.mxu1 %v6194_v22 }
 0x250   :  { %5544 = vmatprep.subr.bf16.mxu1 %v6195_v23 }
 0x253   :  { %5545 = vmatpush3.bf16.msra.mxu1 %v6195_v23 }
 0x254   :  { %5546 = vmatprep.subr.bf16.mxu1 %v6196_v24 }
 0x257   :  { %5547 = vmatpush3.bf16.msra.mxu1 %v6196_v24 }
 0x258   :  { %5548 = vmatprep.subr.bf16.mxu1 %v6197_v25 }
 0x25b   :  { %5549 = vmatpush3.bf16.msra.mxu1 %v6197_v25 }
 0x25c   :  { %5550 = vmatprep.subr.bf16.mxu1 %v6198_v26 }
 0x25f   :  { %5551 = vmatpush3.bf16.msra.mxu1 %v6198_v26 }
 0x260   :  { %5552 = vmatprep.subr.bf16.mxu1 %v6199_v27 }
 0x263   :  { %5553 = vmatpush3.bf16.msra.mxu1 %v6199_v27 }
 0x264   :  { %5554 = vmatprep.subr.bf16.mxu1 %v6200_v28 }
 0x267   :  { %5555 = vmatpush3.bf16.msra.mxu1 %v6200_v28 }
 0x268   :  { %5560 = vmatprep.subr.bf16.mxu1 %v6201_v29 }
 0x315   :  { %v5530_v30 = vpop.f32.mrb[16].mxu1 }
 0x316   :  { %v874_v31 = vpop.f32.mrb[17].mxu1 }
 0x317   :  { %v5531_v32 = vpop.f32.mrb[18].mxu1 }
 0x318   :  { %v890_v33 = vpack.c.bf16 %v5531_v32, %v5530_v30  ;;  %v877_v34 = vpop.f32.mrb[19].mxu1 }
 0x319   :  { %v889_v35 = vpack.c.bf16 %v877_v34, %v874_v31  ;;  %v6230_v34 = vld [vmem:[%s6816_s1 + $0x88] sm:$0xff]  }
 0x31d   :  { %v5538_v36 = vpop.f32.mrb[20].mxu1 }
 0x31e   :  { %v963_v37 = vpop.f32.mrb[21].mxu1 }
 0x31f   :  { %v5539_v38 = vpop.f32.mrb[22].mxu1 }
 0x320   :  { %v979_v39 = vpack.c.bf16 %v5539_v38, %v5538_v36  ;;  %v966_v40 = vpop.f32.mrb[23].mxu1  ;;  %v6233_v36 = vld [vmem:[%s6816_s1 + $0x90] sm:$0xff]   ;;  %v6237_v38 = vld [vmem:[#allocation2 + $0x240] sm:$0xff]  }
 0x321   :  { %v978_v41 = vpack.c.bf16 %v966_v40, %v963_v37  ;;  %v6235_v37 = vld [vmem:[%s6816_s1 + $0xb0] sm:$0xff]   ;;  %v6236_v40 = vld [vmem:[%s6816_s1 + $0xb8] sm:$0xff]  }
 0x323   :  { %5556 = vmatprep.mubr.bf16.mxu1 %v978_v41  ;;  %v6238_v41 = vld [vmem:[#allocation2 + $0x248] sm:$0xff]  }
 0x324   :  { %5557 = vmatmul.mubr.bf16.vlgmr.msra.gmra.mrb[24].mxu1 %v979_v39  ;;  %v6234_v39 = vld [vmem:[%s6816_s1 + $0x98] sm:$0xff]  }
 0x325   :  { %5561 = vmatpush3.bf16.msra.mxu1 %v6201_v29  ;;  %5576 = vmatprep.mubr.bf16.mxu1 %v889_v35  ;;  %v6232_v35 = vld [vmem:[%s6816_s1 + $0xa8] sm:$0xff]  }
 0x326   :  { %5562 = vmatprep.subr.bf16.mxu1 %v6202_v42 }
 0x329   :  { %5563 = vmatpush3.bf16.msra.mxu1 %v6202_v42  ;;  %v6239_v42 = vld [vmem:[#allocation2 + $0x250] sm:$0xff]  }
 0x32a   :  { %5564 = vmatprep.subr.bf16.mxu1 %v6203_v43 }
 0x32d   :  { %5565 = vmatpush3.bf16.msra.mxu1 %v6203_v43  ;;  %v6240_v43 = vld [vmem:[#allocation2 + $0x258] sm:$0xff]  }
 0x32e   :  { %5566 = vmatprep.subr.bf16.mxu1 %v6204_v44 }
 0x331   :  { %5567 = vmatpush3.bf16.msra.mxu1 %v6204_v44  ;;  %v6241_v44 = vld [vmem:[#allocation2 + $0x260] sm:$0xff]  }
 0x332   :  { %5568 = vmatprep.subr.bf16.mxu1 %v6205_v45 }
 0x335   :  { %5569 = vmatpush3.bf16.msra.mxu1 %v6205_v45  ;;  %v6242_v45 = vld [vmem:[#allocation2 + $0x268] sm:$0xff]  }
 0x336   :  { %5570 = vmatprep.subr.bf16.mxu1 %v6206_v46 }
 0x339   :  { %5571 = vmatpush3.bf16.msra.mxu1 %v6206_v46  ;;  %v6243_v46 = vld [vmem:[#allocation2 + $0x270] sm:$0xff]  }
 0x33a   :  { %5572 = vmatprep.subr.bf16.mxu1 %v6207_v47 }
 0x33d   :  { %5573 = vmatpush3.bf16.msra.mxu1 %v6207_v47  ;;  %v6244_v47 = vld [vmem:[#allocation2 + $0x278] sm:$0xff]  }
 0x33e   :  { %5574 = vmatprep.subr.bf16.mxu1 %v6208_v48 }
 0x341   :  { %5575 = vmatpush3.bf16.msra.mxu1 %v6208_v48  ;;  %v6245_v48 = vld [vmem:[#allocation2 + $0x200] sm:$0xff]  }
 0x342   :  { %5580 = vmatprep.subr.bf16.mxu1 %v6522_v17 }
 0x344   :  { %5577 = vmatmul.mubr.bf16.vlgmr.msra.gmra.mrb[24].mxu1 %v890_v33 }
 0x345   :  { %5581 = vmatpush3.bf16.msra.mxu1 %v6522_v17  ;;  %5584 = vmatprep.mubr.msk.bf16.mxu1 %vm65_vm0, %v6209_v49 }
 0x346   :  { %5582 = vmatprep.subr.bf16.mxu1 %v6520_v16 }
 0x349   :  { %5583 = vmatpush3.bf16.msra.mxu1 %v6520_v16 }
 0x34a   :  { %5588 = vmatprep.subr.bf16.mxu1 %v6211_v50 }
 0x34c   :  { %5585 = vmatmul.mubr.msk.bf16.vlgmr.msra.gmra.mrb[28].mxu1 %vm65_vm0, %v6210_v51 }
 0x34d   :  { %5589 = vmatpush3.bf16.msra.mxu1 %v6211_v50 }
 0x34e   :  { %5590 = vmatprep.subr.bf16.mxu1 %v6212_v52 }
 0x351   :  { %5591 = vmatpush3.bf16.msra.mxu1 %v6212_v52 }
 0x352   :  { %5592 = vmatprep.subr.bf16.mxu1 %v6213_v53 }
 0x355   :  { %5593 = vmatpush3.bf16.msra.mxu1 %v6213_v53 }
 0x356   :  { %5594 = vmatprep.subr.bf16.mxu1 %v6214_v54 }
 0x359   :  { %5595 = vmatpush3.bf16.msra.mxu1 %v6214_v54 }
 0x35a   :  { %5596 = vmatprep.subr.bf16.mxu1 %v6215_v55 }
 0x35d   :  { %5597 = vmatpush3.bf16.msra.mxu1 %v6215_v55 }
 0x35e   :  { %5598 = vmatprep.subr.bf16.mxu1 %v6216_v56 }
 0x361   :  { %5599 = vmatpush3.bf16.msra.mxu1 %v6216_v56 }
 0x362   :  { %5600 = vmatprep.subr.bf16.mxu1 %v6217_v57 }
 0x365   :  { %5601 = vmatpush3.bf16.msra.mxu1 %v6217_v57 }
 0x366   :  { %5602 = vmatprep.subr.bf16.mxu1 %v6218_v58 }
 0x369   :  { %5603 = vmatpush3.bf16.msra.mxu1 %v6218_v58 }
 0x36a   :  { %5608 = vmatprep.subr.bf16.mxu1 %v6522_v17 }
 0x41f   :  { %v5586_v59 = vpop.f32.mrb[28].mxu1 }
 0x420   :  { %v1246_v60 = vpop.f32.mrb[29].mxu1 }
 0x421   :  { %v5587_v61 = vpop.f32.mrb[30].mxu1 }
 0x422   :  { %v1262_v62 = vpack.c.bf16 %v5587_v61, %v5586_v59  ;;  %v1249_v63 = vpop.f32.mrb[31].mxu1 }
 0x423   :  { %v1261_v0 = vpack.c.bf16 %v1249_v63, %v1246_v60 }
 0x425   :  { %5604 = vmatprep.mubr.bf16.mxu1 %v1261_v0 }
 0x426   :  { %5605 = vmatmul.mubr.bf16.vlgmr.msra.gmra.mrb[24].mxu1 %v1262_v62 }
 0x427   :  { %5609 = vmatpush3.bf16.msra.mxu1 %v6522_v17  ;;  %5612 = vmatprep.mubr.msk.bf16.mxu1 %vm65_vm0, %v6219_v1  ;;  %v6229_v17 = vld [vmem:[%s6816_s1 + $0x80] sm:$0xff]  }
 0x428   :  { %5610 = vmatprep.subr.bf16.mxu1 %v6520_v16  ;;  %5640 = vmatprep.mubr.msk.bf16.mxu0 %vm65_vm0, %v6229_v17  ;;  %v6254_v17 = vld [vmem:[#allocation2 + $0x288] sm:$0xff]  }
 0x42b   :  { %5611 = vmatpush3.bf16.msra.mxu1 %v6520_v16 }
 0x42c   :  { %5616 = vmatprep.subr.bf16.mxu1 %v6221_v2 }
 0x42e   :  { %5613 = vmatmul.mubr.msk.bf16.vlgmr.msra.gmra.mrb[32].mxu1 %vm65_vm0, %v6220_v3 }
 0x42f   :  { %5617 = vmatpush3.bf16.msra.mxu1 %v6221_v2 }
 0x430   :  { %5618 = vmatprep.subr.bf16.mxu1 %v6222_v4 }
 0x433   :  { %5619 = vmatpush3.bf16.msra.mxu1 %v6222_v4 }
 0x434   :  { %5620 = vmatprep.subr.bf16.mxu1 %v6223_v5 }
 0x437   :  { %5621 = vmatpush3.bf16.msra.mxu1 %v6223_v5 }
 0x438   :  { %5622 = vmatprep.subr.bf16.mxu1 %v6224_v6 }
 0x43b   :  { %5623 = vmatpush3.bf16.msra.mxu1 %v6224_v6 }
 0x43c   :  { %5624 = vmatprep.subr.bf16.mxu1 %v6225_v7 }
 0x43f   :  { %5625 = vmatpush3.bf16.msra.mxu1 %v6225_v7 }
 0x440   :  { %5626 = vmatprep.subr.bf16.mxu1 %v6226_v8 }
 0x443   :  { %5627 = vmatpush3.bf16.msra.mxu1 %v6226_v8 }
 0x444   :  { %5628 = vmatprep.subr.bf16.mxu1 %v6227_v9 }
 0x447   :  { %5629 = vmatpush3.bf16.msra.mxu1 %v6227_v9  ;;  %v6246_v9 = vld [vmem:[#allocation2 + $0x208] sm:$0xff]  }
 0x448   :  { %5630 = vmatprep.subr.bf16.mxu1 %v6228_v10 }
 0x44b   :  { %5631 = vmatpush3.bf16.msra.mxu1 %v6228_v10  ;;  %v6247_v10 = vld [vmem:[#allocation2 + $0x210] sm:$0xff]  }
 0x501   :  { %v5614_v11 = vpop.f32.mrb[32].mxu1 }
 0x502   :  { %v1436_v12 = vpop.f32.mrb[33].mxu1 }
 0x503   :  { %v5615_v13 = vpop.f32.mrb[34].mxu1 }
 0x504   :  { %v1452_v14 = vpack.c.bf16 %v5615_v13, %v5614_v11  ;;  %v1439_v15 = vpop.f32.mrb[35].mxu1  ;;  %v6248_v11 = vld [vmem:[#allocation2 + $0x218] sm:$0xff]   ;;  %v6250_v13 = vld [vmem:[#allocation2 + $0x228] sm:$0xff]  }
 0x505   :  { %v1451_v16 = vpack.c.bf16 %v1439_v15, %v1436_v12  ;;  %v6249_v12 = vld [vmem:[#allocation2 + $0x220] sm:$0xff]   ;;  %v6252_v15 = vld [vmem:[#allocation2 + $0x238] sm:$0xff]  }
 0x507   :  { %5632 = vmatprep.mubr.bf16.mxu1 %v1451_v16  ;;  %v6253_v16 = vld [vmem:[#allocation2 + $0x280] sm:$0xff]  }
 0x508   :  { %5633 = vmatmul.mubr.bf16.vlgmr.msra.gmra.mrb[24].mxu1 %v1452_v14  ;;  %v6251_v14 = vld [vmem:[#allocation2 + $0x230] sm:$0xff]  }
 0x509   :  { %5696 = vmatprep.mubr.msk.bf16.mxu1 %vm65_vm0, %v6231_v18  ;;  %v6255_v18 = vld [vmem:[#allocation2 + $0x290] sm:$0xff]  }
 0x5db   :  { %v5634_v20 = vpop.f32.mrb[24].mxu1 }
 0x5dc   :  { %v1581_v21 = vadd.f32 %v5634_v20, %v4809_v19  ;;  %v1552_v22 = vpop.f32.mrb[25].mxu1  ;;  %v6257_v20 = vld [vmem:[#allocation2 + $0x2a0] sm:$0xff]  }
 0x5dd   :  { %v1579_v23 = vadd.f32 %v4809_v19, %v1552_v22  ;;  %v5635_v24 = vpop.f32.mrb[26].mxu1  ;;  %v6259_v22 = vld [vmem:[#allocation2 + $0x2b0] sm:$0xff]  }
 0x5de   :  { %v1582_v25 = vadd.f32 %v5635_v24, %v4809_v19  ;;  %v1555_v26 = vpop.f32.mrb[27].mxu1  ;;  %v1585_v29 = vmax.f32 %v1581_v21, 0.0  ;;  %v6258_v21 = vld [vmem:[#allocation2 + $0x2a8] sm:$0xff]   ;;  %v6261_v24 = vld [vmem:[#allocation2 + $0x2c0] sm:$0xff]  }
 0x5df   :  { %v1583_v27 = vmax.f32 %v1579_v23, 0.0  ;;  %v1580_v28 = vadd.f32 %v4809_v19, %v1555_v26  ;;  %v6256_v19 = vld [vmem:[#allocation2 + $0x298] sm:$0xff]   ;;  %v6263_v26 = vld [vmem:[#allocation2 + $0x2d0] sm:$0xff]  }
 0x5e0   :  { %v1586_v30 = vmax.f32 %v1582_v25, 0.0  ;;  %v6260_v23 = vld [vmem:[#allocation2 + $0x2b8] sm:$0xff]   ;;  %v6262_v25 = vld [vmem:[#allocation2 + $0x2c8] sm:$0xff]  }
 0x5e1   :  { %4666 = vst [vmem:[%s6820_s5] sm:$0xff] %v1583_v27  ;;  %v1584_v31 = vmax.f32 %v1580_v28, 0.0  ;;  %v6265_v28 = vld [vmem:[#allocation2 + $0x2e0] sm:$0xff]  }
 0x5e2   :  { %v1588_v32 = vpack.c.bf16 %v1586_v30, %v1585_v29  ;;  %v6266_v29 = vld [vmem:[#allocation2 + $0x2e8] sm:$0xff]   ;;  %v6267_v30 = vld [vmem:[#allocation2 + $0x2f0] sm:$0xff]  }
 0x5e3   :  { %v1587_v33 = vpack.c.bf16 %v1584_v31, %v1583_v27  ;;  %v6264_v27 = vld [vmem:[#allocation2 + $0x2d8] sm:$0xff]  }
 0x5e4   :  { %v6268_v31 = vld [vmem:[#allocation2 + $0x2f8] sm:$0xff]  }
 0x5e5   :  { %5636 = vmatprep.subr.bf16.mxu0 %v1587_v33  ;;  %5692 = vmatprep.subr.bf16.mxu1 %v1587_v33 }
 0x5e6   :  { %5637 = vmatpush3.bf16.msra.mxu0 %v1587_v33  ;;  %5693 = vmatpush3.bf16.msra.mxu1 %v1587_v33 }
 0x5e7   :  { %5638 = vmatprep.subr.bf16.mxu0 %v1588_v32  ;;  %5694 = vmatprep.subr.bf16.mxu1 %v1588_v32 }
 0x5ea   :  { %5639 = vmatpush3.bf16.msra.mxu0 %v1588_v32  ;;  %5695 = vmatpush3.bf16.msra.mxu1 %v1588_v32 }
 0x5eb   :  { %5644 = vmatprep.subr.bf16.mxu0 %v1587_v33  ;;  %5720 = vmatprep.subr.bf16.mxu1 %v1587_v33 }
 0x5ed   :  { %5641 = vmatmul.mubr.msk.bf16.vlgmr.msra.gmra.mrb[4].mxu0 %vm65_vm0, %v6230_v34  ;;  %5697 = vmatmul.mubr.msk.bf16.vlgmr.msra.gmra.mrb[36].mxu1 %vm65_vm0, %v6232_v35 }
 0x5ee   :  { %5645 = vmatpush3.bf16.msra.mxu0 %v1587_v33  ;;  %5721 = vmatpush3.bf16.msra.mxu1 %v1587_v33  ;;  %v4875_v33 = vld [vmem:[%s6818_s3 + $0x2] ss:$0 sm:$0xff] }
 0x5ef   :  { %5646 = vmatprep.subr.bf16.mxu0 %v1588_v32  ;;  %5722 = vmatprep.subr.bf16.mxu1 %v1588_v32 }
 0x5f0   :  { %5648 = vmatprep.mubr.msk.bf16.mxu0 %vm65_vm0, %v6233_v36  ;;  %5724 = vmatprep.mubr.msk.bf16.mxu1 %vm65_vm0, %v6235_v37 }
 0x5f2   :  { %5647 = vmatpush3.bf16.msra.mxu0 %v1588_v32  ;;  %5723 = vmatpush3.bf16.msra.mxu1 %v1588_v32  ;;  %v6269_v32 = vld [vmem:[%s6816_s1 + $0xc0] sm:$0xff]  }
 0x5f3   :  { %5652 = vmatprep.subr.bf16.mxu0 %v6237_v38 }
 0x5f5   :  { %5649 = vmatmul.mubr.msk.bf16.vlgmr.msra.gmra.mrb[8].mxu0 %vm65_vm0, %v6234_v39  ;;  %5725 = vmatmul.mubr.msk.bf16.vlgmr.msra.gmra.mrb[40].mxu1 %vm65_vm0, %v6236_v40 }
 0x5f6   :  { %5653 = vmatpush3.bf16.msra.mxu0 %v6237_v38  ;;  %5752 = vmatprep.mubr.msk.bf16.mxu1 %vm65_vm0, %v6269_v32  ;;  %v6303_v32 = vld [vmem:[%s6816_s1 + $0x110] sm:$0xff]  }
 0x5f7   :  { %5654 = vmatprep.subr.bf16.mxu0 %v6238_v41 }
 0x5fa   :  { %5655 = vmatpush3.bf16.msra.mxu0 %v6238_v41 }
 0x5fb   :  { %5656 = vmatprep.subr.bf16.mxu0 %v6239_v42 }
 0x5fe   :  { %5657 = vmatpush3.bf16.msra.mxu0 %v6239_v42 }
 0x5ff   :  { %5658 = vmatprep.subr.bf16.mxu0 %v6240_v43 }
 0x602   :  { %5659 = vmatpush3.bf16.msra.mxu0 %v6240_v43 }
 0x603   :  { %5660 = vmatprep.subr.bf16.mxu0 %v6241_v44 }
 0x606   :  { %5661 = vmatpush3.bf16.msra.mxu0 %v6241_v44 }
 0x607   :  { %5662 = vmatprep.subr.bf16.mxu0 %v6242_v45 }
 0x60a   :  { %5663 = vmatpush3.bf16.msra.mxu0 %v6242_v45 }
 0x60b   :  { %5664 = vmatprep.subr.bf16.mxu0 %v6243_v46 }
 0x60e   :  { %5665 = vmatpush3.bf16.msra.mxu0 %v6243_v46 }
 0x60f   :  { %5666 = vmatprep.subr.bf16.mxu0 %v6244_v47 }
 0x612   :  { %5667 = vmatpush3.bf16.msra.mxu0 %v6244_v47 }
 0x613   :  { %5672 = vmatprep.subr.bf16.mxu0 %v6245_v48 }
 0x6c0   :  { %v5642_v49 = vpop.f32.mrb[4].mxu0  ;;  %v6609_v50 = vpop.f32.mrb[36].mxu1 }
 0x6c1   :  { %v1644_v51 = vpop.f32.mrb[5].mxu0  ;;  %v2016_v52 = vpop.f32.mrb[37].mxu1 }
 0x6c2   :  { %v5643_v53 = vpop.f32.mrb[6].mxu0  ;;  %v6611_v54 = vpop.f32.mrb[38].mxu1 }
 0x6c3   :  { %v1660_v55 = vpack.c.bf16 %v5643_v53, %v5642_v49  ;;  %v1647_v56 = vpop.f32.mrb[7].mxu0  ;;  %v2032_v57 = vpack.c.bf16 %v6611_v54, %v6609_v50  ;;  %v2019_v58 = vpop.f32.mrb[39].mxu1  ;;  %v6271_v49 = vld [vmem:[%s6816_s1 + $0xd0] sm:$0xff]   ;;  %v6273_v50 = vld [vmem:[#allocation2 + $0x340] sm:$0xff]   ;;  %v6276_v54 = vld [vmem:[#allocation2 + $0x358] sm:$0xff]  }
 0x6c4   :  { %v1659_v59 = vpack.c.bf16 %v1647_v56, %v1644_v51  ;;  %v2031_v60 = vpack.c.bf16 %v2019_v58, %v2016_v52  ;;  %v6272_v51 = vld [vmem:[%s6816_s1 + $0xd8] sm:$0xff]   ;;  %v6274_v52 = vld [vmem:[#allocation2 + $0x348] sm:$0xff]   ;;  %v6275_v53 = vld [vmem:[#allocation2 + $0x350] sm:$0xff]  }
 0x6c5   :  { %v6278_v56 = vld [vmem:[#allocation2 + $0x368] sm:$0xff]   ;;  %v6280_v58 = vld [vmem:[#allocation2 + $0x378] sm:$0xff]  }
 0x6c8   :  { %v5650_v61 = vpop.f32.mrb[8].mxu0  ;;  %v6615_v62 = vpop.f32.mrb[40].mxu1 }
 0x6c9   :  { %v1733_v63 = vpop.f32.mrb[9].mxu0  ;;  %v6617_v0 = vpop.f32.mrb[41].mxu1 }
 0x6ca   :  { %v5651_v1 = vpop.f32.mrb[10].mxu0  ;;  %v6619_v2 = vpop.f32.mrb[42].mxu1 }
 0x6cb   :  { %v1749_v3 = vpack.c.bf16 %v5651_v1, %v5650_v61  ;;  %v1736_v4 = vpop.f32.mrb[11].mxu0  ;;  %v2222_v5 = vpack.c.bf16 %v6619_v2, %v6615_v62  ;;  %v2209_v6 = vpop.f32.mrb[43].mxu1 }
 0x6cc   :  { %v1748_v7 = vpack.c.bf16 %v1736_v4, %v1733_v63  ;;  %v2221_v8 = vpack.c.bf16 %v2209_v6, %v6617_v0 }
 0x6ce   :  { %5668 = vmatprep.mubr.bf16.mxu0 %v1748_v7 }
 0x6cf   :  { %5669 = vmatmul.mubr.bf16.vlgmr.msra.gmra.mrb[12].mxu0 %v1749_v3 }
 0x6d0   :  { %5673 = vmatpush3.bf16.msra.mxu0 %v6245_v48  ;;  %5688 = vmatprep.mubr.bf16.mxu0 %v1659_v59  ;;  %v6270_v48 = vld [vmem:[%s6816_s1 + $0xc8] sm:$0xff]   ;;  %v6281_v59 = vld [vmem:[#allocation2 + $0x300] sm:$0xff]  }
 0x6d1   :  { %5674 = vmatprep.subr.bf16.mxu0 %v6246_v9 }
 0x6d4   :  { %5675 = vmatpush3.bf16.msra.mxu0 %v6246_v9  ;;  %v6283_v9 = vld [vmem:[#allocation2 + $0x310] sm:$0xff]  }
 0x6d5   :  { %5676 = vmatprep.subr.bf16.mxu0 %v6247_v10 }
 0x6d8   :  { %5677 = vmatpush3.bf16.msra.mxu0 %v6247_v10  ;;  %v6284_v10 = vld [vmem:[#allocation2 + $0x318] sm:$0xff]  }
 0x6d9   :  { %5678 = vmatprep.subr.bf16.mxu0 %v6248_v11 }
 0x6dc   :  { %5679 = vmatpush3.bf16.msra.mxu0 %v6248_v11  ;;  %v6285_v11 = vld [vmem:[#allocation2 + $0x320] sm:$0xff]  }
 0x6dd   :  { %5680 = vmatprep.subr.bf16.mxu0 %v6249_v12 }
 0x6e0   :  { %5681 = vmatpush3.bf16.msra.mxu0 %v6249_v12  ;;  %v6286_v12 = vld [vmem:[#allocation2 + $0x328] sm:$0xff]  }
 0x6e1   :  { %5682 = vmatprep.subr.bf16.mxu0 %v6250_v13 }
 0x6e4   :  { %5683 = vmatpush3.bf16.msra.mxu0 %v6250_v13  ;;  %v6287_v13 = vld [vmem:[#allocation2 + $0x330] sm:$0xff]  }
 0x6e5   :  { %5684 = vmatprep.subr.bf16.mxu0 %v6251_v14 }
 0x6e8   :  { %5685 = vmatpush3.bf16.msra.mxu0 %v6251_v14  ;;  %v6288_v14 = vld [vmem:[#allocation2 + $0x338] sm:$0xff]  }
 0x6e9   :  { %5686 = vmatprep.subr.bf16.mxu0 %v6252_v15 }
 0x6ec   :  { %5687 = vmatpush3.bf16.msra.mxu0 %v6252_v15  ;;  %v6289_v15 = vld [vmem:[%s6816_s1 + $0xe0] sm:$0xff]  }
 0x6ed   :  { %5700 = vmatprep.subr.bf16.mxu0 %v6253_v16 }
 0x6ef   :  { %5689 = vmatmul.mubr.bf16.vlgmr.msra.gmra.mrb[12].mxu0 %v1660_v55  ;;  %v6277_v55 = vld [vmem:[#allocation2 + $0x360] sm:$0xff]  }
 0x6f0   :  { %5701 = vmatpush3.bf16.msra.mxu0 %v6253_v16  ;;  %5716 = vmatprep.mubr.bf16.mxu0 %v2031_v60  ;;  %v6291_v16 = vld [vmem:[#allocation2 + $0x380] sm:$0xff]  }
 0x6f1   :  { %5702 = vmatprep.subr.bf16.mxu0 %v6254_v17 }
 0x6f4   :  { %5703 = vmatpush3.bf16.msra.mxu0 %v6254_v17  ;;  %v6290_v17 = vld [vmem:[%s6816_s1 + $0xe8] sm:$0xff]  }
 0x6f5   :  { %5704 = vmatprep.subr.bf16.mxu0 %v6255_v18 }
 0x6f8   :  { %5705 = vmatpush3.bf16.msra.mxu0 %v6255_v18  ;;  %v6292_v18 = vld [vmem:[#allocation2 + $0x388] sm:$0xff]  }
 0x6f9   :  { %5706 = vmatprep.subr.bf16.mxu0 %v6256_v19 }
 0x6fc   :  { %5707 = vmatpush3.bf16.msra.mxu0 %v6256_v19  ;;  %v6293_v19 = vld [vmem:[#allocation2 + $0x390] sm:$0xff]  }
 0x6fd   :  { %5708 = vmatprep.subr.bf16.mxu0 %v6257_v20 }
 0x700   :  { %5709 = vmatpush3.bf16.msra.mxu0 %v6257_v20  ;;  %v6294_v20 = vld [vmem:[#allocation2 + $0x398] sm:$0xff]  }
 0x701   :  { %5710 = vmatprep.subr.bf16.mxu0 %v6258_v21 }
 0x704   :  { %5711 = vmatpush3.bf16.msra.mxu0 %v6258_v21  ;;  %v6295_v21 = vld [vmem:[#allocation2 + $0x3a0] sm:$0xff]  }
 0x705   :  { %5712 = vmatprep.subr.bf16.mxu0 %v6259_v22 }
 0x708   :  { %5713 = vmatpush3.bf16.msra.mxu0 %v6259_v22  ;;  %v6296_v22 = vld [vmem:[#allocation2 + $0x3a8] sm:$0xff]  }
 0x709   :  { %5714 = vmatprep.subr.bf16.mxu0 %v6260_v23 }
 0x70c   :  { %5715 = vmatpush3.bf16.msra.mxu0 %v6260_v23  ;;  %v6297_v23 = vld [vmem:[#allocation2 + $0x3b0] sm:$0xff]  }
 0x70d   :  { %5728 = vmatprep.subr.bf16.mxu0 %v6261_v24 }
 0x70f   :  { %5717 = vmatmul.mubr.bf16.vlgmr.msra.gmra.mrb[12].mxu0 %v2032_v57  ;;  %v6279_v57 = vld [vmem:[#allocation2 + $0x370] sm:$0xff]  }
 0x710   :  { %5729 = vmatpush3.bf16.msra.mxu0 %v6261_v24  ;;  %5744 = vmatprep.mubr.bf16.mxu0 %v2221_v8  ;;  %v6282_v8 = vld [vmem:[#allocation2 + $0x308] sm:$0xff]   ;;  %v6298_v24 = vld [vmem:[#allocation2 + $0x3b8] sm:$0xff]  }
 0x711   :  { %5730 = vmatprep.subr.bf16.mxu0 %v6262_v25 }
 0x714   :  { %5731 = vmatpush3.bf16.msra.mxu0 %v6262_v25 }
 0x715   :  { %5732 = vmatprep.subr.bf16.mxu0 %v6263_v26 }
 0x718   :  { %5733 = vmatpush3.bf16.msra.mxu0 %v6263_v26 }
 0x719   :  { %5734 = vmatprep.subr.bf16.mxu0 %v6264_v27 }
 0x71c   :  { %5735 = vmatpush3.bf16.msra.mxu0 %v6264_v27 }
 0x71d   :  { %5736 = vmatprep.subr.bf16.mxu0 %v6265_v28 }
 0x720   :  { %5737 = vmatpush3.bf16.msra.mxu0 %v6265_v28 }
 0x721   :  { %5738 = vmatprep.subr.bf16.mxu0 %v6266_v29 }
 0x724   :  { %5739 = vmatpush3.bf16.msra.mxu0 %v6266_v29 }
 0x725   :  { %5740 = vmatprep.subr.bf16.mxu0 %v6267_v30 }
 0x728   :  { %5741 = vmatpush3.bf16.msra.mxu0 %v6267_v30 }
 0x729   :  { %5742 = vmatprep.subr.bf16.mxu0 %v6268_v31 }
 0x72c   :  { %5743 = vmatpush3.bf16.msra.mxu0 %v6268_v31  ;;  %v6299_v31 = vld [vmem:[%s6816_s1 + $0xf0] sm:$0xff]  }
 0x72f   :  { %5745 = vmatmul.mubr.bf16.vlgmr.msra.gmra.mrb[12].mxu0 %v2222_v5 }
 0x730   :  { %5836 = vmatprep.mubr.msk.bf16.mxu0 %vm65_vm0, %v6299_v31  ;;  %v6322_v31 = vld [vmem:[#allocation2 + $0x448] sm:$0xff]  }
 0x802   :  { %v5746_v34 = vpop.f32.mrb[12].mxu0 }
 0x803   :  { %v2322_v35 = vpop.f32.mrb[13].mxu0  ;;  %v6641_v40 = vadd.f32 %v5746_v34, %v4875_v33 }
 0x804   :  { %v6637_v36 = vadd.f32 %v4875_v33, %v2322_v35  ;;  %v5747_v37 = vpop.f32.mrb[14].mxu0 }
 0x805   :  { %v6639_v38 = vadd.f32 %v5747_v37, %v4875_v33  ;;  %v2325_v39 = vpop.f32.mrb[15].mxu0  ;;  %v2355_v45 = vmax.f32 %v6641_v40, 0.0 }
 0x806   :  { %v6643_v41 = vadd.f32 %v4875_v33, %v2325_v39  ;;  %v2353_v42 = vmax.f32 %v6637_v36, 0.0  ;;  %v4925_v33 = vld [vmem:[%s6818_s3 + $0x3] ss:$0 sm:$0xff]  ;;  %v6330_v36 = vld [vmem:[%s6816_s1 + $0x128] sm:$0xff]  }
 0x807   :  { %v2356_v43 = vmax.f32 %v6639_v38, 0.0  ;;  %v6334_v38 = vld [vmem:[%s6816_s1 + $0x148] sm:$0xff]  }
 0x808   :  { %v2354_v44 = vmax.f32 %v6643_v41, 0.0  ;;  %v6331_v41 = vld [vmem:[%s6816_s1 + $0x130] sm:$0xff]  }
 0x809   :  { %v6659_v47 = vpack.c.bf16 %v2356_v43, %v2355_v45 }
 0x80a   :  { %v6653_v46 = vpack.c.bf16 %v2354_v44, %v2353_v42 }
 0x80c   :  { %5748 = vmatprep.subr.bf16.mxu1 %v6653_v46 }
 0x80d   :  { %5749 = vmatpush3.bf16.msra.mxu1 %v6653_v46 }
 0x80e   :  { %5750 = vmatprep.subr.bf16.mxu1 %v6659_v47 }
 0x811   :  { %5751 = vmatpush3.bf16.msra.mxu1 %v6659_v47 }
 0x812   :  { %5756 = vmatprep.subr.bf16.mxu1 %v6653_v46 }
 0x814   :  { %5753 = vmatmul.mubr.msk.bf16.vlgmr.msra.gmra.mrb[44].mxu1 %vm65_vm0, %v6270_v48 }
 0x815   :  { %5757 = vmatpush3.bf16.msra.mxu1 %v6653_v46  ;;  %5760 = vmatprep.mubr.msk.bf16.mxu1 %vm65_vm0, %v6271_v49 }
 0x816   :  { %5758 = vmatprep.subr.bf16.mxu1 %v6659_v47 }
 0x819   :  { %5759 = vmatpush3.bf16.msra.mxu1 %v6659_v47 }
 0x81a   :  { %5764 = vmatprep.subr.bf16.mxu1 %v6273_v50 }
 0x81c   :  { %5761 = vmatmul.mubr.msk.bf16.vlgmr.msra.gmra.mrb[48].mxu1 %vm65_vm0, %v6272_v51 }
 0x81d   :  { %5765 = vmatpush3.bf16.msra.mxu1 %v6273_v50 }
 0x81e   :  { %5766 = vmatprep.subr.bf16.mxu1 %v6274_v52 }
 0x821   :  { %5767 = vmatpush3.bf16.msra.mxu1 %v6274_v52 }
 0x822   :  { %5768 = vmatprep.subr.bf16.mxu1 %v6275_v53 }
 0x825   :  { %5769 = vmatpush3.bf16.msra.mxu1 %v6275_v53 }
 0x826   :  { %5770 = vmatprep.subr.bf16.mxu1 %v6276_v54 }
 0x829   :  { %5771 = vmatpush3.bf16.msra.mxu1 %v6276_v54 }
 0x82a   :  { %5772 = vmatprep.subr.bf16.mxu1 %v6277_v55 }
 0x82d   :  { %5773 = vmatpush3.bf16.msra.mxu1 %v6277_v55 }
 0x82e   :  { %5774 = vmatprep.subr.bf16.mxu1 %v6278_v56 }
 0x831   :  { %5775 = vmatpush3.bf16.msra.mxu1 %v6278_v56  ;;  %v6300_v56 = vld [vmem:[%s6816_s1 + $0xf8] sm:$0xff]  }
 0x832   :  { %5776 = vmatprep.subr.bf16.mxu1 %v6279_v57 }
 0x835   :  { %5777 = vmatpush3.bf16.msra.mxu1 %v6279_v57  ;;  %v6304_v57 = vld [vmem:[%s6816_s1 + $0x118] sm:$0xff]  }
 0x836   :  { %5778 = vmatprep.subr.bf16.mxu1 %v6280_v58 }
 0x839   :  { %5779 = vmatpush3.bf16.msra.mxu1 %v6280_v58  ;;  %v6301_v58 = vld [vmem:[%s6816_s1 + $0x100] sm:$0xff]  }
 0x83a   :  { %5784 = vmatprep.subr.bf16.mxu1 %v6281_v59 }
 0x8e7   :  { %v5754_v60 = vpop.f32.mrb[44].mxu1 }
 0x8e8   :  { %v2414_v61 = vpop.f32.mrb[45].mxu1 }
 0x8e9   :  { %v5755_v62 = vpop.f32.mrb[46].mxu1 }
 0x8ea   :  { %v2430_v63 = vpack.c.bf16 %v5755_v62, %v5754_v60  ;;  %v2417_v0 = vpop.f32.mrb[47].mxu1  ;;  %v6302_v60 = vld [vmem:[%s6816_s1 + $0x108] sm:$0xff]   ;;  %v6307_v62 = vld [vmem:[#allocation2 + $0x410] sm:$0xff]  }
 0x8eb   :  { %v2429_v1 = vpack.c.bf16 %v2417_v0, %v2414_v61  ;;  %v6306_v61 = vld [vmem:[#allocation2 + $0x408] sm:$0xff]   ;;  %v6309_v0 = vld [vmem:[#allocation2 + $0x420] sm:$0xff]  }
 0x8ef   :  { %v5762_v2 = vpop.f32.mrb[48].mxu1 }
 0x8f0   :  { %v2503_v3 = vpop.f32.mrb[49].mxu1 }
 0x8f1   :  { %v5763_v4 = vpop.f32.mrb[50].mxu1 }
 0x8f2   :  { %v2519_v5 = vpack.c.bf16 %v5763_v4, %v5762_v2  ;;  %v2506_v6 = vpop.f32.mrb[51].mxu1  ;;  %v6311_v2 = vld [vmem:[#allocation2 + $0x430] sm:$0xff]   ;;  %v6313_v4 = vld [vmem:[#allocation2 + $0x3c0] sm:$0xff]  }
 0x8f3   :  { %v2518_v7 = vpack.c.bf16 %v2506_v6, %v2503_v3  ;;  %v6312_v3 = vld [vmem:[#allocation2 + $0x438] sm:$0xff]  }
 0x8f5   :  { %5780 = vmatprep.mubr.bf16.mxu1 %v2518_v7 }
 0x8f6   :  { %5781 = vmatmul.mubr.bf16.vlgmr.msra.gmra.mrb[52].mxu1 %v2519_v5 }
 0x8f7   :  { %5785 = vmatpush3.bf16.msra.mxu1 %v6281_v59  ;;  %5800 = vmatprep.mubr.bf16.mxu1 %v2429_v1  ;;  %v6305_v59 = vld [vmem:[#allocation2 + $0x400] sm:$0xff]   ;;  %v6310_v1 = vld [vmem:[#allocation2 + $0x428] sm:$0xff]  }
 0x8f8   :  { %5786 = vmatprep.subr.bf16.mxu1 %v6282_v8 }
 0x8fb   :  { %5787 = vmatpush3.bf16.msra.mxu1 %v6282_v8 }
 0x8fc   :  { %5788 = vmatprep.subr.bf16.mxu1 %v6283_v9 }
 0x8ff   :  { %5789 = vmatpush3.bf16.msra.mxu1 %v6283_v9 }
 0x900   :  { %5790 = vmatprep.subr.bf16.mxu1 %v6284_v10 }
 0x903   :  { %5791 = vmatpush3.bf16.msra.mxu1 %v6284_v10 }
 0x904   :  { %5792 = vmatprep.subr.bf16.mxu1 %v6285_v11 }
 0x907   :  { %5793 = vmatpush3.bf16.msra.mxu1 %v6285_v11 }
 0x908   :  { %5794 = vmatprep.subr.bf16.mxu1 %v6286_v12 }
 0x90b   :  { %5795 = vmatpush3.bf16.msra.mxu1 %v6286_v12 }
 0x90c   :  { %5796 = vmatprep.subr.bf16.mxu1 %v6287_v13 }
 0x90f   :  { %5797 = vmatpush3.bf16.msra.mxu1 %v6287_v13 }
 0x910   :  { %5798 = vmatprep.subr.bf16.mxu1 %v6288_v14 }
 0x913   :  { %5799 = vmatpush3.bf16.msra.mxu1 %v6288_v14 }
 0x914   :  { %5804 = vmatprep.subr.bf16.mxu1 %v6653_v46 }
 0x916   :  { %5801 = vmatmul.mubr.bf16.vlgmr.msra.gmra.mrb[52].mxu1 %v2430_v63  ;;  %v6308_v63 = vld [vmem:[#allocation2 + $0x418] sm:$0xff]  }
 0x917   :  { %5805 = vmatpush3.bf16.msra.mxu1 %v6653_v46  ;;  %5808 = vmatprep.mubr.msk.bf16.mxu1 %vm65_vm0, %v6289_v15 }
 0x918   :  { %5806 = vmatprep.subr.bf16.mxu1 %v6659_v47 }
 0x91b   :  { %5807 = vmatpush3.bf16.msra.mxu1 %v6659_v47 }
 0x91c   :  { %5812 = vmatprep.subr.bf16.mxu1 %v6291_v16 }
 0x91e   :  { %5809 = vmatmul.mubr.msk.bf16.vlgmr.msra.gmra.mrb[56].mxu1 %vm65_vm0, %v6290_v17 }
 0x91f   :  { %5813 = vmatpush3.bf16.msra.mxu1 %v6291_v16 }
 0x920   :  { %5814 = vmatprep.subr.bf16.mxu1 %v6292_v18 }
 0x923   :  { %5815 = vmatpush3.bf16.msra.mxu1 %v6292_v18 }
 0x924   :  { %5816 = vmatprep.subr.bf16.mxu1 %v6293_v19 }
 0x927   :  { %5817 = vmatpush3.bf16.msra.mxu1 %v6293_v19 }
 0x928   :  { %5818 = vmatprep.subr.bf16.mxu1 %v6294_v20 }
 0x92b   :  { %5819 = vmatpush3.bf16.msra.mxu1 %v6294_v20 }
 0x92c   :  { %5820 = vmatprep.subr.bf16.mxu1 %v6295_v21 }
 0x92f   :  { %5821 = vmatpush3.bf16.msra.mxu1 %v6295_v21 }
 0x930   :  { %5822 = vmatprep.subr.bf16.mxu1 %v6296_v22 }
 0x933   :  { %5823 = vmatpush3.bf16.msra.mxu1 %v6296_v22 }
 0x934   :  { %5824 = vmatprep.subr.bf16.mxu1 %v6297_v23 }
 0x937   :  { %5825 = vmatpush3.bf16.msra.mxu1 %v6297_v23  ;;  %v6314_v23 = vld [vmem:[#allocation2 + $0x3c8] sm:$0xff]  }
 0x938   :  { %5826 = vmatprep.subr.bf16.mxu1 %v6298_v24 }
 0x93b   :  { %5827 = vmatpush3.bf16.msra.mxu1 %v6298_v24  ;;  %v6315_v24 = vld [vmem:[#allocation2 + $0x3d0] sm:$0xff]  }
 0x9f1   :  { %v5810_v25 = vpop.f32.mrb[56].mxu1 }
 0x9f2   :  { %v2786_v26 = vpop.f32.mrb[57].mxu1 }
 0x9f3   :  { %v5811_v27 = vpop.f32.mrb[58].mxu1 }
 0x9f4   :  { %v2802_v28 = vpack.c.bf16 %v5811_v27, %v5810_v25  ;;  %v2789_v29 = vpop.f32.mrb[59].mxu1  ;;  %v6316_v25 = vld [vmem:[#allocation2 + $0x3d8] sm:$0xff]   ;;  %v6318_v27 = vld [vmem:[#allocation2 + $0x3e8] sm:$0xff]  }
 0x9f5   :  { %v2801_v30 = vpack.c.bf16 %v2789_v29, %v2786_v26  ;;  %v6317_v26 = vld [vmem:[#allocation2 + $0x3e0] sm:$0xff]   ;;  %v6320_v29 = vld [vmem:[#allocation2 + $0x3f8] sm:$0xff]  }
 0x9f7   :  { %5828 = vmatprep.mubr.bf16.mxu1 %v2801_v30  ;;  %v6321_v30 = vld [vmem:[#allocation2 + $0x440] sm:$0xff]  }
 0x9f8   :  { %5829 = vmatmul.mubr.bf16.vlgmr.msra.gmra.mrb[52].mxu1 %v2802_v28  ;;  %v6319_v28 = vld [vmem:[#allocation2 + $0x3f0] sm:$0xff]  }
 0x9f9   :  { %5892 = vmatprep.mubr.msk.bf16.mxu1 %vm65_vm0, %v6303_v32  ;;  %v6323_v32 = vld [vmem:[#allocation2 + $0x450] sm:$0xff]  }
 0xacb   :  { %v5830_v34 = vpop.f32.mrb[52].mxu1 }
 0xacc   :  { %v2931_v35 = vadd.f32 %v5830_v34, %v4925_v33  ;;  %v2902_v37 = vpop.f32.mrb[53].mxu1  ;;  %v6325_v34 = vld [vmem:[#allocation2 + $0x460] sm:$0xff]  }
 0xacd   :  { %v2929_v39 = vadd.f32 %v4925_v33, %v2902_v37  ;;  %v5831_v46 = vpop.f32.mrb[54].mxu1  ;;  %v6327_v37 = vld [vmem:[#allocation2 + $0x470] sm:$0xff]  }
 0xace   :  { %v2932_v47 = vadd.f32 %v5831_v46, %v4925_v33  ;;  %v2905_v48 = vpop.f32.mrb[55].mxu1  ;;  %v2935_v50 = vmax.f32 %v2931_v35, 0.0  ;;  %v6326_v35 = vld [vmem:[#allocation2 + $0x468] sm:$0xff]   ;;  %v6329_v46 = vld [vmem:[%s6816_s1 + $0x120] sm:$0xff]  }
 0xacf   :  { %v2930_v49 = vadd.f32 %v4925_v33, %v2905_v48  ;;  %v2933_v52 = vmax.f32 %v2929_v39, 0.0  ;;  %v6324_v33 = vld [vmem:[#allocation2 + $0x458] sm:$0xff]   ;;  %v4975_v48 = vld [vmem:[%s6818_s3 + $0x4] ss:$0 sm:$0xff] }
 0xad0   :  { %v2936_v51 = vmax.f32 %v2932_v47, 0.0  ;;  %v6328_v39 = vld [vmem:[#allocation2 + $0x478] sm:$0xff]   ;;  %v6333_v47 = vld [vmem:[%s6816_s1 + $0x140] sm:$0xff]  }
 0xad1   :  { %v2934_v53 = vmax.f32 %v2930_v49, 0.0 }
 0xad2   :  { %v2938_v54 = vpack.c.bf16 %v2936_v51, %v2935_v50 }
 0xad3   :  { %v2937_v55 = vpack.c.bf16 %v2934_v53, %v2933_v52 }
 0xad5   :  { %5832 = vmatprep.subr.bf16.mxu0 %v2937_v55  ;;  %5888 = vmatprep.subr.bf16.mxu1 %v2937_v55 }
 0xad6   :  { %5833 = vmatpush3.bf16.msra.mxu0 %v2937_v55  ;;  %5889 = vmatpush3.bf16.msra.mxu1 %v2937_v55 }
 0xad7   :  { %5834 = vmatprep.subr.bf16.mxu0 %v2938_v54  ;;  %5890 = vmatprep.subr.bf16.mxu1 %v2938_v54 }
 0xada   :  { %5835 = vmatpush3.bf16.msra.mxu0 %v2938_v54  ;;  %5891 = vmatpush3.bf16.msra.mxu1 %v2938_v54 }
 0xadb   :  { %5840 = vmatprep.subr.bf16.mxu0 %v2937_v55 }
 0xadd   :  { %5837 = vmatmul.mubr.msk.bf16.vlgmr.msra.gmra.mrb[16].mxu0 %vm65_vm0, %v6300_v56  ;;  %5893 = vmatmul.mubr.msk.bf16.vlgmr.msra.gmra.mrb[60].mxu1 %vm65_vm0, %v6304_v57 }
 0xade   :  { %5841 = vmatpush3.bf16.msra.mxu0 %v2937_v55  ;;  %5844 = vmatprep.mubr.msk.bf16.mxu0 %vm65_vm0, %v6301_v58 }
 0xadf   :  { %5842 = vmatprep.subr.bf16.mxu0 %v2938_v54  ;;  %5920 = vmatprep.mubr.msk.bf16.mxu1 %vm65_vm0, %v6329_v46  ;;  %v6356_v46 = vld [vmem:[#allocation2 + $0x528] sm:$0xff]  }
 0xae2   :  { %5843 = vmatpush3.bf16.msra.mxu0 %v2938_v54 }
 0xae3   :  { %5848 = vmatprep.subr.bf16.mxu0 %v6305_v59 }
 0xae5   :  { %5845 = vmatmul.mubr.msk.bf16.vlgmr.msra.gmra.mrb[20].mxu0 %vm65_vm0, %v6302_v60 }
 0xae6   :  { %5849 = vmatpush3.bf16.msra.mxu0 %v6305_v59 }
 0xae7   :  { %5850 = vmatprep.subr.bf16.mxu0 %v6306_v61 }
 0xaea   :  { %5851 = vmatpush3.bf16.msra.mxu0 %v6306_v61 }
 0xaeb   :  { %5852 = vmatprep.subr.bf16.mxu0 %v6307_v62 }
 0xaee   :  { %5853 = vmatpush3.bf16.msra.mxu0 %v6307_v62 }
 0xaef   :  { %5854 = vmatprep.subr.bf16.mxu0 %v6308_v63 }
 0xaf2   :  { %5855 = vmatpush3.bf16.msra.mxu0 %v6308_v63 }
 0xaf3   :  { %5856 = vmatprep.subr.bf16.mxu0 %v6309_v0 }
 0xaf6   :  { %5857 = vmatpush3.bf16.msra.mxu0 %v6309_v0 }
 0xaf7   :  { %5858 = vmatprep.subr.bf16.mxu0 %v6310_v1 }
 0xafa   :  { %5859 = vmatpush3.bf16.msra.mxu0 %v6310_v1  ;;  %v6337_v1 = vld [vmem:[#allocation2 + $0x4d0] sm:$0xff]  }
 0xafb   :  { %5860 = vmatprep.subr.bf16.mxu0 %v6311_v2 }
 0xafe   :  { %5861 = vmatpush3.bf16.msra.mxu0 %v6311_v2  ;;  %v6338_v2 = vld [vmem:[#allocation2 + $0x4d8] sm:$0xff]  }
 0xaff   :  { %5862 = vmatprep.subr.bf16.mxu0 %v6312_v3 }
 0xb02   :  { %5863 = vmatpush3.bf16.msra.mxu0 %v6312_v3  ;;  %v6339_v3 = vld [vmem:[#allocation2 + $0x4e0] sm:$0xff]  }
 0xb03   :  { %5868 = vmatprep.subr.bf16.mxu0 %v6313_v4 }
 0xbb0   :  { %v5838_v5 = vpop.f32.mrb[16].mxu0  ;;  %v6720_v6 = vpop.f32.mrb[60].mxu1 }
 0xbb1   :  { %v2994_v7 = vpop.f32.mrb[17].mxu0  ;;  %v3366_v8 = vpop.f32.mrb[61].mxu1 }
 0xbb2   :  { %v5839_v9 = vpop.f32.mrb[18].mxu0  ;;  %v6722_v10 = vpop.f32.mrb[62].mxu1 }
 0xbb3   :  { %v3010_v11 = vpack.c.bf16 %v5839_v9, %v5838_v5  ;;  %v2997_v12 = vpop.f32.mrb[19].mxu0  ;;  %v3382_v13 = vpack.c.bf16 %v6722_v10, %v6720_v6  ;;  %v3369_v14 = vpop.f32.mrb[63].mxu1  ;;  %v6341_v5 = vld [vmem:[#allocation2 + $0x4f0] sm:$0xff]   ;;  %v6342_v6 = vld [vmem:[#allocation2 + $0x4f8] sm:$0xff]  }
 0xbb4   :  { %v3009_v15 = vpack.c.bf16 %v2997_v12, %v2994_v7  ;;  %v3381_v16 = vpack.c.bf16 %v3369_v14, %v3366_v8  ;;  %v6343_v7 = vld [vmem:[#allocation2 + $0x480] sm:$0xff]  }
 0xbb8   :  { %v5846_v17 = vpop.f32.mrb[20].mxu0 }
 0xbb9   :  { %v3083_v18 = vpop.f32.mrb[21].mxu0 }
 0xbba   :  { %v5847_v19 = vpop.f32.mrb[22].mxu0 }
 0xbbb   :  { %v3099_v20 = vpack.c.bf16 %v5847_v19, %v5846_v17  ;;  %v3086_v21 = vpop.f32.mrb[23].mxu0 }
 0xbbc   :  { %v3098_v22 = vpack.c.bf16 %v3086_v21, %v3083_v18 }
 0xbbe   :  { %5864 = vmatprep.mubr.bf16.mxu0 %v3098_v22 }
 0xbbf   :  { %5865 = vmatmul.mubr.bf16.vlgmr.msra.gmra.mrb[24].mxu0 %v3099_v20 }
 0xbc0   :  { %5869 = vmatpush3.bf16.msra.mxu0 %v6313_v4  ;;  %5884 = vmatprep.mubr.bf16.mxu0 %v3009_v15  ;;  %v6340_v4 = vld [vmem:[#allocation2 + $0x4e8] sm:$0xff]  }
 0xbc1   :  { %5870 = vmatprep.subr.bf16.mxu0 %v6314_v23 }
 0xbc4   :  { %5871 = vmatpush3.bf16.msra.mxu0 %v6314_v23 }
 0xbc5   :  { %5872 = vmatprep.subr.bf16.mxu0 %v6315_v24 }
 0xbc8   :  { %5873 = vmatpush3.bf16.msra.mxu0 %v6315_v24 }
 0xbc9   :  { %5874 = vmatprep.subr.bf16.mxu0 %v6316_v25 }
 0xbcc   :  { %5875 = vmatpush3.bf16.msra.mxu0 %v6316_v25 }
 0xbcd   :  { %5876 = vmatprep.subr.bf16.mxu0 %v6317_v26 }
 0xbd0   :  { %5877 = vmatpush3.bf16.msra.mxu0 %v6317_v26  ;;  %v6344_v26 = vld [vmem:[#allocation2 + $0x488] sm:$0xff]  }
 0xbd1   :  { %5878 = vmatprep.subr.bf16.mxu0 %v6318_v27 }
 0xbd4   :  { %5879 = vmatpush3.bf16.msra.mxu0 %v6318_v27  ;;  %v6345_v27 = vld [vmem:[#allocation2 + $0x490] sm:$0xff]  }
 0xbd5   :  { %5880 = vmatprep.subr.bf16.mxu0 %v6319_v28 }
 0xbd8   :  { %5881 = vmatpush3.bf16.msra.mxu0 %v6319_v28  ;;  %v6346_v28 = vld [vmem:[#allocation2 + $0x498] sm:$0xff]  }
 0xbd9   :  { %5882 = vmatprep.subr.bf16.mxu0 %v6320_v29 }
 0xbdc   :  { %5883 = vmatpush3.bf16.msra.mxu0 %v6320_v29  ;;  %v6347_v29 = vld [vmem:[#allocation2 + $0x4a0] sm:$0xff]  }
 0xbdd   :  { %5896 = vmatprep.subr.bf16.mxu0 %v6321_v30 }
 0xbdf   :  { %5885 = vmatmul.mubr.bf16.vlgmr.msra.gmra.mrb[24].mxu0 %v3010_v11 }
 0xbe0   :  { %5897 = vmatpush3.bf16.msra.mxu0 %v6321_v30  ;;  %5912 = vmatprep.mubr.bf16.mxu0 %v3381_v16  ;;  %v6348_v30 = vld [vmem:[#allocation2 + $0x4a8] sm:$0xff]  }
 0xbe1   :  { %5898 = vmatprep.subr.bf16.mxu0 %v6322_v31 }
 0xbe4   :  { %5899 = vmatpush3.bf16.msra.mxu0 %v6322_v31  ;;  %v6349_v31 = vld [vmem:[#allocation2 + $0x4b0] sm:$0xff]  }
 0xbe5   :  { %5900 = vmatprep.subr.bf16.mxu0 %v6323_v32 }
 0xbe8   :  { %5901 = vmatpush3.bf16.msra.mxu0 %v6323_v32  ;;  %v6350_v32 = vld [vmem:[#allocation2 + $0x4b8] sm:$0xff]  }
 0xbe9   :  { %5902 = vmatprep.subr.bf16.mxu0 %v6324_v33 }
 0xbec   :  { %5903 = vmatpush3.bf16.msra.mxu0 %v6324_v33  ;;  %v6351_v33 = vld [vmem:[#allocation2 + $0x500] sm:$0xff]  }
 0xbed   :  { %5904 = vmatprep.subr.bf16.mxu0 %v6325_v34 }
 0xbf0   :  { %5905 = vmatpush3.bf16.msra.mxu0 %v6325_v34  ;;  %v6352_v34 = vld [vmem:[#allocation2 + $0x508] sm:$0xff]  }
 0xbf1   :  { %5906 = vmatprep.subr.bf16.mxu0 %v6326_v35 }
 0xbf4   :  { %5907 = vmatpush3.bf16.msra.mxu0 %v6326_v35  ;;  %v6353_v35 = vld [vmem:[#allocation2 + $0x510] sm:$0xff]  }
 0xbf5   :  { %5908 = vmatprep.subr.bf16.mxu0 %v6327_v37 }
 0xbf8   :  { %5909 = vmatpush3.bf16.msra.mxu0 %v6327_v37  ;;  %v6354_v37 = vld [vmem:[#allocation2 + $0x518] sm:$0xff]  }
 0xbf9   :  { %5910 = vmatprep.subr.bf16.mxu0 %v6328_v39 }
 0xbfc   :  { %5911 = vmatpush3.bf16.msra.mxu0 %v6328_v39  ;;  %v6355_v39 = vld [vmem:[#allocation2 + $0x520] sm:$0xff]  }
 0xbff   :  { %5913 = vmatmul.mubr.bf16.vlgmr.msra.gmra.mrb[24].mxu0 %v3382_v13 }
 0xc00   :  { %5976 = vmatprep.mubr.msk.bf16.mxu0 %vm65_vm0, %v6333_v47  ;;  %v6357_v47 = vld [vmem:[#allocation2 + $0x530] sm:$0xff]  }
 0xcd2   :  { %v5914_v49 = vpop.f32.mrb[24].mxu0 }
 0xcd3   :  { %v3511_v50 = vadd.f32 %v5914_v49, %v4975_v48  ;;  %v3482_v51 = vpop.f32.mrb[25].mxu0  ;;  %v6359_v49 = vld [vmem:[%s6816_s1 + $0x150] sm:$0xff]  }
 0xcd4   :  { %v3509_v52 = vadd.f32 %v4975_v48, %v3482_v51  ;;  %v5915_v53 = vpop.f32.mrb[26].mxu0  ;;  %v6372_v51 = vld [vmem:[#allocation2 + $0x548] sm:$0xff]  }
 0xcd5   :  { %v3515_v54 = vadd.f32 %v3511_v50, %v2355_v45  ;;  %v3512_v55 = vadd.f32 %v5915_v53, %v4975_v48  ;;  %v3485_v56 = vpop.f32.mrb[27].mxu0  ;;  %v6371_v50 = vld [vmem:[#allocation2 + $0x540] sm:$0xff]   ;;  %v6374_v53 = vld [vmem:[#allocation2 + $0x558] sm:$0xff]  }
 0xcd6   :  { %v6741_v57 = vadd.f32 %v3509_v52, %v2353_v42  ;;  %v3510_v58 = vadd.f32 %v4975_v48, %v3485_v56  ;;  %v6335_v42 = vld [vmem:[#allocation2 + $0x4c0] sm:$0xff]   ;;  %v6358_v48 = vld [vmem:[#allocation2 + $0x538] sm:$0xff]   ;;  %v6373_v52 = vld [vmem:[#allocation2 + $0x550] sm:$0xff]  }
 0xcd7   :  { %v3516_v59 = vadd.f32 %v3512_v55, %v2356_v43  ;;  %v3519_v61 = vmax.f32 %v3515_v54, 0.0  ;;  %v6332_v43 = vld [vmem:[%s6816_s1 + $0x138] sm:$0xff]   ;;  %v6375_v54 = vld [vmem:[#allocation2 + $0x560] sm:$0xff]   ;;  %v6376_v55 = vld [vmem:[#allocation2 + $0x568] sm:$0xff]  }
 0xcd8   :  { %v3514_v60 = vadd.f32 %v3510_v58, %v2354_v44  ;;  %v3517_v63 = vmax.f32 %v6741_v57, 0.0  ;;  %v6336_v44 = vld [vmem:[#allocation2 + $0x4c8] sm:$0xff]   ;;  %v6377_v56 = vld [vmem:[#allocation2 + $0x570] sm:$0xff]   ;;  %v5025_v58 = vld [vmem:[%s6818_s3 + $0x5] ss:$0 sm:$0xff] }
 0xcd9   :  { %v3520_v62 = vmax.f32 %v3516_v59, 0.0 }
 0xcda   :  { %v3518_v0 = vmax.f32 %v3514_v60, 0.0 }
 0xcdb   :  { %v3522_v40 = vpack.c.bf16 %v3520_v62, %v3519_v61 }
 0xcdc   :  { %v3521_v45 = vpack.c.bf16 %v3518_v0, %v3517_v63 }
 0xcde   :  { %5916 = vmatprep.subr.bf16.mxu1 %v3521_v45  ;;  %5972 = vmatprep.subr.bf16.mxu0 %v3521_v45 }
 0xcdf   :  { %5917 = vmatpush3.bf16.msra.mxu1 %v3521_v45  ;;  %5973 = vmatpush3.bf16.msra.mxu0 %v3521_v45 }
 0xce0   :  { %5918 = vmatprep.subr.bf16.mxu1 %v3522_v40  ;;  %5974 = vmatprep.subr.bf16.mxu0 %v3522_v40 }
 0xce3   :  { %5919 = vmatpush3.bf16.msra.mxu1 %v3522_v40  ;;  %5975 = vmatpush3.bf16.msra.mxu0 %v3522_v40 }
 0xce4   :  { %5924 = vmatprep.subr.bf16.mxu1 %v3521_v45 }
 0xce6   :  { %5921 = vmatmul.mubr.msk.bf16.vlgmr.msra.gmra.mrb[64].mxu1 %vm65_vm0, %v6330_v36  ;;  %5977 = vmatmul.mubr.msk.bf16.vlgmr.msra.gmra.mrb[28].mxu0 %vm65_vm0, %v6334_v38 }
 0xce7   :  { %5925 = vmatpush3.bf16.msra.mxu1 %v3521_v45  ;;  %5928 = vmatprep.mubr.msk.bf16.mxu1 %vm65_vm0, %v6331_v41 }
 0xce8   :  { %5926 = vmatprep.subr.bf16.mxu1 %v3522_v40  ;;  %6004 = vmatprep.mubr.msk.bf16.mxu0 %vm65_vm0, %v6359_v49 }
 0xceb   :  { %5927 = vmatpush3.bf16.msra.mxu1 %v3522_v40 }
 0xcec   :  { %5932 = vmatprep.subr.bf16.mxu1 %v6335_v42 }
 0xcee   :  { %5929 = vmatmul.mubr.msk.bf16.vlgmr.msra.gmra.mrb[68].mxu1 %vm65_vm0, %v6332_v43 }
 0xcef   :  { %5933 = vmatpush3.bf16.msra.mxu1 %v6335_v42 }
 0xcf0   :  { %5934 = vmatprep.subr.bf16.mxu1 %v6336_v44 }
 0xcf3   :  { %5935 = vmatpush3.bf16.msra.mxu1 %v6336_v44 }
 0xcf4   :  { %5936 = vmatprep.subr.bf16.mxu1 %v6337_v1 }
 0xcf7   :  { %5937 = vmatpush3.bf16.msra.mxu1 %v6337_v1 }
 0xcf8   :  { %5938 = vmatprep.subr.bf16.mxu1 %v6338_v2 }
 0xcfb   :  { %5939 = vmatpush3.bf16.msra.mxu1 %v6338_v2  ;;  %v6360_v2 = vld [vmem:[%s6816_s1 + $0x158] sm:$0xff]  }
 0xcfc   :  { %5940 = vmatprep.subr.bf16.mxu1 %v6339_v3 }
 0xcff   :  { %5941 = vmatpush3.bf16.msra.mxu1 %v6339_v3  ;;  %v6361_v3 = vld [vmem:[%s6816_s1 + $0x160] sm:$0xff]  }
 0xd00   :  { %5942 = vmatprep.subr.bf16.mxu1 %v6340_v4 }
 0xd03   :  { %5943 = vmatpush3.bf16.msra.mxu1 %v6340_v4  ;;  %v6363_v4 = vld [vmem:[#allocation2 + $0x580] sm:$0xff]  }
 0xd04   :  { %5944 = vmatprep.subr.bf16.mxu1 %v6341_v5 }
 0xd07   :  { %5945 = vmatpush3.bf16.msra.mxu1 %v6341_v5  ;;  %v6362_v5 = vld [vmem:[%s6816_s1 + $0x168] sm:$0xff]  }
 0xd08   :  { %5946 = vmatprep.subr.bf16.mxu1 %v6342_v6 }
 0xd0b   :  { %5947 = vmatpush3.bf16.msra.mxu1 %v6342_v6  ;;  %v6364_v6 = vld [vmem:[#allocation2 + $0x588] sm:$0xff]  }
 0xd0c   :  { %5952 = vmatprep.subr.bf16.mxu1 %v6343_v7 }
 0xdb9   :  { %v5922_v8 = vpop.f32.mrb[64].mxu1  ;;  %v6766_v9 = vpop.f32.mrb[28].mxu0 }
 0xdba   :  { %v3578_v10 = vpop.f32.mrb[65].mxu1  ;;  %v3950_v11 = vpop.f32.mrb[29].mxu0 }
 0xdbb   :  { %v5923_v12 = vpop.f32.mrb[66].mxu1  ;;  %v6768_v13 = vpop.f32.mrb[30].mxu0 }
 0xdbc   :  { %v3594_v14 = vpack.c.bf16 %v5923_v12, %v5922_v8  ;;  %v3581_v15 = vpop.f32.mrb[67].mxu1  ;;  %v3966_v16 = vpack.c.bf16 %v6768_v13, %v6766_v9  ;;  %v3953_v17 = vpop.f32.mrb[31].mxu0  ;;  %v6366_v8 = vld [vmem:[#allocation2 + $0x598] sm:$0xff]   ;;  %v6367_v9 = vld [vmem:[#allocation2 + $0x5a0] sm:$0xff]  }
 0xdbd   :  { %v3593_v18 = vpack.c.bf16 %v3581_v15, %v3578_v10  ;;  %v3965_v19 = vpack.c.bf16 %v3953_v17, %v3950_v11  ;;  %v6368_v10 = vld [vmem:[#allocation2 + $0x5a8] sm:$0xff]   ;;  %v6369_v11 = vld [vmem:[#allocation2 + $0x5b0] sm:$0xff]   ;;  %v6370_v12 = vld [vmem:[#allocation2 + $0x5b8] sm:$0xff]  }
 0xdbe   :  { %v6378_v13 = vld [vmem:[#allocation2 + $0x578] sm:$0xff]  }
 0xdc1   :  { %v5930_v20 = vpop.f32.mrb[68].mxu1 }
 0xdc2   :  { %v3667_v21 = vpop.f32.mrb[69].mxu1 }
 0xdc3   :  { %v5931_v22 = vpop.f32.mrb[70].mxu1 }
 0xdc4   :  { %v3683_v23 = vpack.c.bf16 %v5931_v22, %v5930_v20  ;;  %v3670_v24 = vpop.f32.mrb[71].mxu1 }
 0xdc5   :  { %v3682_v25 = vpack.c.bf16 %v3670_v24, %v3667_v21 }
 0xdc7   :  { %5948 = vmatprep.mubr.bf16.mxu1 %v3682_v25 }
 0xdc8   :  { %5949 = vmatmul.mubr.bf16.vlgmr.msra.gmra.mrb[72].mxu1 %v3683_v23 }
 0xdc9   :  { %5953 = vmatpush3.bf16.msra.mxu1 %v6343_v7  ;;  %5968 = vmatprep.mubr.bf16.mxu1 %v3593_v18  ;;  %v6365_v7 = vld [vmem:[#allocation2 + $0x590] sm:$0xff]  }
 0xdca   :  { %5954 = vmatprep.subr.bf16.mxu1 %v6344_v26 }
 0xdcd   :  { %5955 = vmatpush3.bf16.msra.mxu1 %v6344_v26  ;;  %v6379_v26 = vld [vmem:[%s6816_s1 + $0x170] sm:$0xff]  }
 0xdce   :  { %5956 = vmatprep.subr.bf16.mxu1 %v6345_v27 }
 0xdd1   :  { %5957 = vmatpush3.bf16.msra.mxu1 %v6345_v27  ;;  %v6381_v27 = vld [vmem:[#allocation2 + $0x5c0] sm:$0xff]  }
 0xdd2   :  { %5958 = vmatprep.subr.bf16.mxu1 %v6346_v28 }
 0xdd5   :  { %5959 = vmatpush3.bf16.msra.mxu1 %v6346_v28  ;;  %v6380_v28 = vld [vmem:[%s6816_s1 + $0x178] sm:$0xff]  }
 0xdd6   :  { %5960 = vmatprep.subr.bf16.mxu1 %v6347_v29 }
 0xdd9   :  { %5961 = vmatpush3.bf16.msra.mxu1 %v6347_v29  ;;  %v6382_v29 = vld [vmem:[#allocation2 + $0x5c8] sm:$0xff]  }
 0xdda   :  { %5962 = vmatprep.subr.bf16.mxu1 %v6348_v30 }
 0xddd   :  { %5963 = vmatpush3.bf16.msra.mxu1 %v6348_v30  ;;  %v6383_v30 = vld [vmem:[#allocation2 + $0x5d0] sm:$0xff]  }
 0xdde   :  { %5964 = vmatprep.subr.bf16.mxu1 %v6349_v31 }
 0xde1   :  { %5965 = vmatpush3.bf16.msra.mxu1 %v6349_v31  ;;  %v6384_v31 = vld [vmem:[#allocation2 + $0x5d8] sm:$0xff]  }
 0xde2   :  { %5966 = vmatprep.subr.bf16.mxu1 %v6350_v32 }
 0xde5   :  { %5967 = vmatpush3.bf16.msra.mxu1 %v6350_v32  ;;  %v6385_v32 = vld [vmem:[#allocation2 + $0x5e0] sm:$0xff]  }
 0xde6   :  { %5980 = vmatprep.subr.bf16.mxu1 %v6351_v33 }
 0xde8   :  { %5969 = vmatmul.mubr.bf16.vlgmr.msra.gmra.mrb[72].mxu1 %v3594_v14 }
 0xde9   :  { %5981 = vmatpush3.bf16.msra.mxu1 %v6351_v33  ;;  %5996 = vmatprep.mubr.bf16.mxu1 %v3965_v19  ;;  %v6386_v33 = vld [vmem:[#allocation2 + $0x5e8] sm:$0xff]  }
 0xdea   :  { %5982 = vmatprep.subr.bf16.mxu1 %v6352_v34 }
 0xded   :  { %5983 = vmatpush3.bf16.msra.mxu1 %v6352_v34  ;;  %v6387_v34 = vld [vmem:[#allocation2 + $0x5f0] sm:$0xff]  }
 0xdee   :  { %5984 = vmatprep.subr.bf16.mxu1 %v6353_v35 }
 0xdf1   :  { %5985 = vmatpush3.bf16.msra.mxu1 %v6353_v35  ;;  %v6388_v35 = vld [vmem:[#allocation2 + $0x5f8] sm:$0xff]  }
 0xdf2   :  { %5986 = vmatprep.subr.bf16.mxu1 %v6354_v37 }
 0xdf5   :  { %5987 = vmatpush3.bf16.msra.mxu1 %v6354_v37 }
 0xdf6   :  { %5988 = vmatprep.subr.bf16.mxu1 %v6355_v39 }
 0xdf9   :  { %5989 = vmatpush3.bf16.msra.mxu1 %v6355_v39 }
 0xdfa   :  { %5990 = vmatprep.subr.bf16.mxu1 %v6356_v46 }
 0xdfd   :  { %5991 = vmatpush3.bf16.msra.mxu1 %v6356_v46 }
 0xdfe   :  { %5992 = vmatprep.subr.bf16.mxu1 %v6357_v47 }
 0xe01   :  { %5993 = vmatpush3.bf16.msra.mxu1 %v6357_v47 }
 0xe02   :  { %5994 = vmatprep.subr.bf16.mxu1 %v6358_v48 }
 0xe05   :  { %5995 = vmatpush3.bf16.msra.mxu1 %v6358_v48 }
 0xe06   :  { %6036 = vmatprep.subr.bf16.mxu1 %v6371_v50 }
 0xe08   :  { %5997 = vmatmul.mubr.bf16.vlgmr.msra.gmra.mrb[72].mxu1 %v3966_v16 }
 0xe09   :  { %6037 = vmatpush3.bf16.msra.mxu1 %v6371_v50 }
 0xe0a   :  { %6038 = vmatprep.subr.bf16.mxu1 %v6372_v51 }
 0xe0d   :  { %6039 = vmatpush3.bf16.msra.mxu1 %v6372_v51 }
 0xe0e   :  { %6040 = vmatprep.subr.bf16.mxu1 %v6373_v52 }
 0xe11   :  { %6041 = vmatpush3.bf16.msra.mxu1 %v6373_v52 }
 0xe12   :  { %6042 = vmatprep.subr.bf16.mxu1 %v6374_v53 }
 0xe15   :  { %6043 = vmatpush3.bf16.msra.mxu1 %v6374_v53 }
 0xe16   :  { %6044 = vmatprep.subr.bf16.mxu1 %v6375_v54 }
 0xe19   :  { %6045 = vmatpush3.bf16.msra.mxu1 %v6375_v54 }
 0xe1a   :  { %6046 = vmatprep.subr.bf16.mxu1 %v6376_v55 }
 0xe1d   :  { %6047 = vmatpush3.bf16.msra.mxu1 %v6376_v55 }
 0xe1e   :  { %6048 = vmatprep.subr.bf16.mxu1 %v6377_v56 }
 0xe21   :  { %6049 = vmatpush3.bf16.msra.mxu1 %v6377_v56 }
 0xe22   :  { %6050 = vmatprep.subr.bf16.mxu1 %v6378_v13 }
 0xe25   :  { %6051 = vmatpush3.bf16.msra.mxu1 %v6378_v13 }
 0xedb   :  { %v5998_v59 = vpop.f32.mrb[72].mxu1 }
 0xedc   :  { %v4095_v60 = vadd.f32 %v5998_v59, %v5025_v58  ;;  %v4066_v61 = vpop.f32.mrb[73].mxu1 }
 0xedd   :  { %v4093_v62 = vadd.f32 %v5025_v58, %v4066_v61  ;;  %v5999_v0 = vpop.f32.mrb[74].mxu1 }
 0xede   :  { %v4096_v40 = vadd.f32 %v5999_v0, %v5025_v58  ;;  %v4069_v45 = vpop.f32.mrb[75].mxu1  ;;  %v4099_v38 = vmax.f32 %v4095_v60, 0.0 }
 0xedf   :  { %v4094_v36 = vadd.f32 %v5025_v58, %v4069_v45  ;;  %v4097_v42 = vmax.f32 %v4093_v62, 0.0  ;;  %v5075_v62 = vld [vmem:[%s6818_s3 + $0x6] ss:$0 sm:$0xff] }
 0xee0   :  { %v4100_v41 = vmax.f32 %v4096_v40, 0.0 }
 0xee1   :  { %v4098_v43 = vmax.f32 %v4094_v36, 0.0 }
 0xee2   :  { %v6779_v44 = vpack.c.bf16 %v4100_v41, %v4099_v38 }
 0xee3   :  { %v4101_v1 = vpack.c.bf16 %v4098_v43, %v4097_v42 }
 0xee5   :  { %6000 = vmatprep.subr.bf16.mxu0 %v4101_v1 }
 0xee6   :  { %6001 = vmatpush3.bf16.msra.mxu0 %v4101_v1 }
 0xee7   :  { %6002 = vmatprep.subr.bf16.mxu0 %v6779_v44 }
 0xeea   :  { %6003 = vmatpush3.bf16.msra.mxu0 %v6779_v44 }
 0xeeb   :  { %6008 = vmatprep.subr.bf16.mxu0 %v4101_v1 }
 0xeed   :  { %6005 = vmatmul.mubr.msk.bf16.vlgmr.msra.gmra.mrb[32].mxu0 %vm65_vm0, %v6360_v2 }
 0xeee   :  { %6009 = vmatpush3.bf16.msra.mxu0 %v4101_v1  ;;  %6012 = vmatprep.mubr.msk.bf16.mxu0 %vm65_vm0, %v6361_v3 }
 0xeef   :  { %6010 = vmatprep.subr.bf16.mxu0 %v6779_v44 }
 0xef2   :  { %6011 = vmatpush3.bf16.msra.mxu0 %v6779_v44 }
 0xef3   :  { %6016 = vmatprep.subr.bf16.mxu0 %v6363_v4 }
 0xef5   :  { %6013 = vmatmul.mubr.msk.bf16.vlgmr.msra.gmra.mrb[36].mxu0 %vm65_vm0, %v6362_v5 }
 0xef6   :  { %6017 = vmatpush3.bf16.msra.mxu0 %v6363_v4 }
 0xef7   :  { %6018 = vmatprep.subr.bf16.mxu0 %v6364_v6 }
 0xefa   :  { %6019 = vmatpush3.bf16.msra.mxu0 %v6364_v6 }
 0xefb   :  { %6020 = vmatprep.subr.bf16.mxu0 %v6365_v7 }
 0xefe   :  { %6021 = vmatpush3.bf16.msra.mxu0 %v6365_v7 }
 0xeff   :  { %6022 = vmatprep.subr.bf16.mxu0 %v6366_v8 }
 0xf02   :  { %6023 = vmatpush3.bf16.msra.mxu0 %v6366_v8 }
 0xf03   :  { %6024 = vmatprep.subr.bf16.mxu0 %v6367_v9 }
 0xf06   :  { %6025 = vmatpush3.bf16.msra.mxu0 %v6367_v9 }
 0xf07   :  { %6026 = vmatprep.subr.bf16.mxu0 %v6368_v10 }
 0xf0a   :  { %6027 = vmatpush3.bf16.msra.mxu0 %v6368_v10 }
 0xf0b   :  { %6028 = vmatprep.subr.bf16.mxu0 %v6369_v11 }
 0xf0e   :  { %6029 = vmatpush3.bf16.msra.mxu0 %v6369_v11 }
 0xf0f   :  { %6030 = vmatprep.subr.bf16.mxu0 %v6370_v12 }
 0xf12   :  { %6031 = vmatpush3.bf16.msra.mxu0 %v6370_v12 }
 0xf13   :  { %6056 = vmatprep.subr.bf16.mxu0 %v4101_v1 }
 0xfc0   :  { %v6006_v14 = vpop.f32.mrb[32].mxu0 }
 0xfc1   :  { %v4158_v15 = vpop.f32.mrb[33].mxu0 }
 0xfc2   :  { %v6007_v16 = vpop.f32.mrb[34].mxu0 }
 0xfc3   :  { %v4174_v17 = vpack.c.bf16 %v6007_v16, %v6006_v14  ;;  %v4161_v18 = vpop.f32.mrb[35].mxu0 }
 0xfc4   :  { %v4173_v19 = vpack.c.bf16 %v4161_v18, %v4158_v15 }
 0xfc6   :  { %6052 = vmatprep.mubr.bf16.mxu1 %v4173_v19 }
 0xfc7   :  { %6053 = vmatmul.mubr.bf16.vlgmr.msra.gmra.mrb[76].mxu1 %v4174_v17 }
 0xfc8   :  { %v6014_v20 = vpop.f32.mrb[36].mxu0 }
 0xfc9   :  { %v4247_v21 = vpop.f32.mrb[37].mxu0 }
 0xfca   :  { %v6015_v22 = vpop.f32.mrb[38].mxu0 }
 0xfcb   :  { %v4263_v23 = vpack.c.bf16 %v6015_v22, %v6014_v20  ;;  %v4250_v24 = vpop.f32.mrb[39].mxu0 }
 0xfcc   :  { %v4262_v25 = vpack.c.bf16 %v4250_v24, %v4247_v21 }
 0xfce   :  { %6032 = vmatprep.mubr.bf16.mxu0 %v4262_v25 }
 0xfcf   :  { %6033 = vmatmul.mubr.bf16.vlgmr.msra.gmra.mrb[40].mxu0 %v4263_v23 }
 0xfd0   :  { %6057 = vmatpush3.bf16.msra.mxu0 %v4101_v1  ;;  %6060 = vmatprep.mubr.msk.bf16.mxu0 %vm65_vm0, %v6379_v26 }
 0xfd1   :  { %6058 = vmatprep.subr.bf16.mxu0 %v6779_v44 }
 0xfd4   :  { %6059 = vmatpush3.bf16.msra.mxu0 %v6779_v44 }
 0xfd5   :  { %6064 = vmatprep.subr.bf16.mxu0 %v6381_v27 }
 0xfd7   :  { %6061 = vmatmul.mubr.msk.bf16.vlgmr.msra.gmra.mrb[44].mxu0 %vm65_vm0, %v6380_v28 }
 0xfd8   :  { %6065 = vmatpush3.bf16.msra.mxu0 %v6381_v27 }
 0xfd9   :  { %6066 = vmatprep.subr.bf16.mxu0 %v6382_v29 }
 0xfdc   :  { %6067 = vmatpush3.bf16.msra.mxu0 %v6382_v29 }
 0xfdd   :  { %6068 = vmatprep.subr.bf16.mxu0 %v6383_v30 }
 0xfe0   :  { %6069 = vmatpush3.bf16.msra.mxu0 %v6383_v30 }
 0xfe1   :  { %6070 = vmatprep.subr.bf16.mxu0 %v6384_v31 }
 0xfe4   :  { %6071 = vmatpush3.bf16.msra.mxu0 %v6384_v31 }
 0xfe5   :  { %6072 = vmatprep.subr.bf16.mxu0 %v6385_v32 }
 0xfe8   :  { %6073 = vmatpush3.bf16.msra.mxu0 %v6385_v32 }
 0xfe9   :  { %6074 = vmatprep.subr.bf16.mxu0 %v6386_v33 }
 0xfec   :  { %6075 = vmatpush3.bf16.msra.mxu0 %v6386_v33 }
 0xfed   :  { %6076 = vmatprep.subr.bf16.mxu0 %v6387_v34 }
 0xff0   :  { %6077 = vmatpush3.bf16.msra.mxu0 %v6387_v34 }
 0xff1   :  { %6078 = vmatprep.subr.bf16.mxu0 %v6388_v35 }
 0xff4   :  { %6079 = vmatpush3.bf16.msra.mxu0 %v6388_v35 }
0x109a   :  { %v6054_v37 = vpop.f32.mrb[76].mxu1 }
0x109b   :  { %v4457_v39 = vpop.f32.mrb[77].mxu1 }
0x109c   :  { %v6055_v46 = vpop.f32.mrb[78].mxu1 }
0x109d   :  { %v4460_v47 = vpop.f32.mrb[79].mxu1 }
0x10a2   :  { %v6034_v48 = vpop.f32.mrb[40].mxu0 }
0x10a3   :  { %v4363_v49 = vpop.f32.mrb[41].mxu0 }
0x10a4   :  { %v4458_v50 = vadd.f32 %v4457_v39, %v4363_v49  ;;  %v6035_v51 = vpop.f32.mrb[42].mxu0 }
0x10a5   :  { %v4366_v52 = vpop.f32.mrb[43].mxu0 }
0x10aa   :  { %v6062_v53 = vpop.f32.mrb[44].mxu0 }
0x10ab   :  { %v4524_v54 = vpop.f32.mrb[45].mxu0 }
0x10ac   :  { %v6063_v55 = vpop.f32.mrb[46].mxu0 }
0x10ad   :  { %v4540_v56 = vpack.c.bf16 %v6063_v55, %v6062_v53  ;;  %v4527_v58 = vpop.f32.mrb[47].mxu0 }
0x10ae   :  { %v4539_v59 = vpack.c.bf16 %v4527_v58, %v4524_v54 }
0x10b0   :  { %6080 = vmatprep.mubr.bf16.mxu0 %v4539_v59 }
0x10b1   :  { %6081 = vmatmul.mubr.bf16.vlgmr.msra.gmra.mrb[48].mxu0 %v4540_v56 }
0x1184   :  { %v6082_v60 = vpop.f32.mrb[48].mxu0 }
0x1185   :  { %v4640_v61 = vpop.f32.mrb[49].mxu0 }
0x1186   :  { %v4652_v0 = vadd.f32 %v4640_v61, %v4458_v50  ;;  %v6083_v40 = vpop.f32.mrb[50].mxu0 }
0x1187   :  { %v4643_v45 = vpop.f32.mrb[51].mxu0 }
0x1188   :  { %v4661_v36 = vadd.f32 %v5075_v62, %v4652_v0 }
0x118a   :  { %v4662_v38 = vadd.f32 %v4661_v36, %v3517_v63 }
0x118c   :  { %v4663_v41 = vmax.f32 %v4662_v38, 0.0 }
0x118e   :  { %4667 = vst [vmem:[%s6821_s6] sm:$0xff] %v4663_v41 }
0x118f   :  { %4680 = vsyncpa [#allocation3], 1 }

</bundles_post_ra>
